<compile_context>
chip_gen: v7x
topology: tpu7x:2x2x1
jax: 0.10.0
libtpu: 0.0.40
codegen_flags: <defaults>
</compile_context>

<pallas_src>
import functools

import jax
import jax.numpy as jnp
from jax import lax
from jax.experimental import pallas as pl
from jax.experimental.pallas import tpu as pltpu


def _pick_tile(total, candidates):
    """Largest candidate <= total that evenly divides `total`, else `total`."""
    for c in candidates:
        if c <= total and total % c == 0:
            return c
    return total


def _dwconv3x3_flat(x, w9, bias, masks, W):
    """Depthwise 3x3 'SAME' conv on the row-major flattened (tc, H*W) layout.

    Each tap is a cyclic lane rotation (XLU, pltpu.roll) of the flat image,
    multiplied by a precomputed border mask that zeroes entries whose source
    pixel falls outside the H x W grid.  No padded scratch, no unaligned stores.
      x: (tc, M) f32, w9: (tc, 9), bias: (tc, 1), masks: (9, M) f32.
    """
    _, M = x.shape
    acc = None
    for t in range(9):
        dh, dw = t // 3 - 1, t % 3 - 1              # tap offsets in {-1,0,1}
        d = dh * W + dw                             # offset in flat layout
        if d == 0:
            shifted = x
        else:
            # want out[m] = x[m + d]; jnp.roll semantics: out[j] = in[(j-s)%M]
            shifted = pltpu.roll(x, shift=(-d) % M, axis=1)
            shifted = shifted * masks[t:t + 1, :]   # zero out-of-grid taps
        term = shifted * w9[:, t:t + 1]
        acc = term if acc is None else acc + term
    return acc + bias


# ---------------------------------------------------------------------------
# Fused kernel:
#   grid = (B, C/tc, Npad/tk); k (N tiles) is the contraction axis.
#   k loop : acc += tokens_bf16 @ flatten_bf16          (MXU, f32 accumulate)
#   epilogue (last k): BN affine -> dwconv3x3 -> ReLU -> dwconv3x3 -> scale
#                      -> inflate gather -> + tokens (residual, f32 exact)
# ---------------------------------------------------------------------------
def spatial_mix_kernel(tokb_ref, flat_ref, colsum_ref, idx_ref, prm_ref,
                       mask_ref, tokres_ref, out_ref, acc_ref, *, W):
    k = pl.program_id(2)

    @pl.when(k == 0)
    def _init():
        acc_ref[...] = jnp.zeros_like(acc_ref)

    # Raw projection (3d -> 2d): bf16 operands, f32 accumulation.  BN affine is
    # hoisted out of this loop (applied in the epilogue).
    acc_ref[...] += jnp.dot(tokb_ref[0], flat_ref[0],
                            preferred_element_type=jnp.float32)

    @pl.when(k == pl.num_programs(2) - 1)
    def _epilogue():
        p = prm_ref[...]                            # (tc, 23) packed params
        bn_scale, bn_shift = p[:, 0:1], p[:, 1:2]
        b1, b2, ls = p[:, 2:3], p[:, 3:4], p[:, 4:5]
        w1, w2 = p[:, 5:14], p[:, 14:23]
        masks = mask_ref[...]                       # (9, M) conv border masks

        # BatchNorm1d (inference) folded affine, hoisted:
        #   (tok*s + b) @ F == s * (tok @ F) + b * colsum(F)
        x = acc_ref[...] * bn_scale + bn_shift * colsum_ref[0]     # (tc, M) f32

        y = _dwconv3x3_flat(x, w1, b1, masks, W)
        y = jnp.maximum(y, 0.0)                     # ReLU
        y = _dwconv3x3_flat(y, w2, b2, masks, W)
        y = y * ls                                  # layer scale (1x1 depthwise)

        # Inflate: exact gather of grid cells back to points via an in-VMEM
        # 0/1 one-hot + MXU matmul (f32 -> exact).  See TODO(synk) at top.
        idx = idx_ref[0]                            # (1, Npad) int32 cell index
        M = y.shape[1]
        npts = idx.shape[1]
        cells = lax.broadcasted_iota(jnp.int32, (M, npts), 0)
        onehot = (cells == idx).astype(jnp.float32)                # (M, Npad)
        gathered = jnp.dot(y, onehot, preferred_element_type=jnp.float32)

        out_ref[0] = (tokres_ref[0] + gathered).astype(out_ref.dtype)


# ---------------------------------------------------------------------------
# Wrapper
# ---------------------------------------------------------------------------
def spatial_mix_forward(tokens, flatten, cell_idx, params, grid_shape):
    B, C, N = tokens.shape
    H, W = grid_shape
    M = H * W
    assert flatten.shape == (B, N, M)

    # Lane-dense padding of the point axis (clean tiles, unmasked stores).
    Npad = ((N + 127) // 128) * 128
    pad_n = Npad - N
    tokens_f32 = jnp.pad(tokens.astype(jnp.float32),
                         ((0, 0), (0, 0), (0, pad_n)))
    tokens_bf16 = tokens_f32.astype(jnp.bfloat16)                 # matmul stream
    flatten_f32 = jnp.pad(flatten.astype(jnp.float32),
                          ((0, 0), (0, pad_n), (0, 0)))
    flatten_bf16 = flatten_f32.astype(jnp.bfloat16)               # matmul stream
    colsum = jnp.sum(flatten_f32, axis=1).reshape(B, 1, M)        # for BN shift
    idx_p = jnp.pad(cell_idx.astype(jnp.int32),
                    ((0, 0), (0, pad_n))).reshape(B, 1, Npad)

    # Fold BatchNorm1d (inference mode) into a per-channel affine.
    eps = 1e-5
    bn_scale = params["bn_gamma"] / jnp.sqrt(params["bn_var"] + eps)
    bn_shift = params["bn_beta"] - params["bn_mean"] * bn_scale

    # Pack all per-channel parameters into a single (C, 23) block.
    # cols: [bn_scale, bn_shift, b1, b2, layer_scale, w1[0:9], w2[0:9]]
    packed = jnp.concatenate([
        bn_scale.reshape(C, 1), bn_shift.reshape(C, 1),
        params["b1"].reshape(C, 1), params["b2"].reshape(C, 1),
        params["layer_scale"].reshape(C, 1),
        params["w1"].reshape(C, 9), params["w2"].reshape(C, 9),
    ], axis=1).astype(jnp.float32)
    P = packed.shape[1]

    # Per-tap border masks of the 3x3 conv on the flat H*W layout (host-built,
    # compile-time constant; avoids in-kernel int div/mod).
    hh = jnp.arange(M, dtype=jnp.int32) // W
    ww = jnp.arange(M, dtype=jnp.int32) % W
    masks = jnp.stack([
        ((hh + dh >= 0) & (hh + dh < H) & (ww + dw >= 0) & (ww + dw < W))
        for dh in (-1, 0, 1) for dw in (-1, 0, 1)
    ]).astype(jnp.float32)                                        # (9, M)

    # --- Tile selection: big channel tile first (flatten is re-read C/tc
    # times, so tc sets the arithmetic intensity); shrink against a 40 MiB
    # VMEM budget so blocks fit v7x's 64 MiB physical VMEM with headroom.
    # (On v5e, tc caps itself via the budget/divisibility; 128 is plenty there.)
    tc = _pick_tile(C, (256, 128, 64, 32, 16, 8))
    tk = _pick_tile(Npad, (512, 256, 128))

    def vmem_bytes(tc_, tk_):
        b = 2 * tc_ * tk_ * 2                  # tokens bf16 stream (x2 buffers)
        b += 2 * tk_ * M * 2                   # flatten bf16
        b += 2 * 2 * tc_ * Npad * 4            # tokens f32 residual + output
        b += tc_ * M * 4                       # accumulator scratch
        b += 2 * (8 * M + 8 * Npad + tc_ * 128 + 16 * M) * 4   # small operands
        b += 2 * M * Npad * 4                  # epilogue iota + one-hot temps
        return b

    budget = 40 * 1024 * 1024
    while vmem_bytes(tc, tk) > budget:
        if tk > 128 and Npad % (tk // 2) == 0:
            tk //= 2
        elif tc > 8 and C % (tc // 2) == 0:
            tc //= 2
        else:
            break

    grid = (B, C // tc, Npad // tk)

    out_p = pl.pallas_call(
        functools.partial(spatial_mix_kernel, W=W),
        out_shape=jax.ShapeDtypeStruct((B, C, Npad), jnp.float32),
        grid=grid,
        in_specs=[
            pl.BlockSpec((1, tc, tk), lambda bi, ci, ki: (bi, ci, ki)),   # tokens bf16
            pl.BlockSpec((1, tk, M), lambda bi, ci, ki: (bi, ki, 0)),     # flatten bf16
            pl.BlockSpec((1, 1, M), lambda bi, ci, ki: (bi, 0, 0)),       # colsum(F)
            pl.BlockSpec((1, 1, Npad), lambda bi, ci, ki: (bi, 0, 0)),    # inflate idx
            pl.BlockSpec((tc, P), lambda bi, ci, ki: (ci, 0)),            # packed params
            pl.BlockSpec((9, M), lambda bi, ci, ki: (0, 0)),              # conv masks
            pl.BlockSpec((1, tc, Npad), lambda bi, ci, ki: (bi, ci, 0)),  # tokens f32
        ],
        out_specs=pl.BlockSpec((1, tc, Npad), lambda bi, ci, ki: (bi, ci, 0)),
        scratch_shapes=[pltpu.VMEM((tc, M), jnp.float32)],
        input_output_aliases={6: 0},            # residual tokens -> output buffer
        compiler_params=pltpu.CompilerParams(
            dimension_semantics=("parallel", "parallel", "arbitrary"),
            vmem_limit_bytes=48 * 1024 * 1024),
    )(tokens_bf16, flatten_bf16, colsum, idx_p, packed, masks, tokens_f32)

    return out_p[:, :, :N]


# ---------------------------------------------------------------------------
# Pure-JAX reference (correctness oracle).  proj_dtype=bf16 mirrors the
# kernel's reduced-precision projection operands (f32 accumulation); the
# mathematics (BN hoist) is identical to BN -> projection of the module.
# ---------------------------------------------------------------------------
def spatial_mix_reference(tokens, flatten, cell_idx, params, grid_shape,
                          proj_dtype=jnp.float32):
    B, C, N = tokens.shape
    H, W = grid_shape
    M = H * W
    eps = 1e-5
    scale = params["bn_gamma"] / jnp.sqrt(params["bn_var"] + eps)
    shift = params["bn_beta"] - params["bn_mean"] * scale

    raw = jnp.einsum("bcn,bnm->bcm", tokens.astype(proj_dtype),
                     flatten.astype(proj_dtype),
                     preferred_element_type=jnp.float32)
    colsum = jnp.sum(flatten, axis=1)                               # (B, M)
    proj = raw * scale[None, :, None] + shift[None, :, None] * colsum[:, None, :]
    g = proj.reshape(B, C, H, W)

    dn = ("NCHW", "OIHW", "NCHW")
    y = lax.conv_general_dilated(
        g, params["w1"].reshape(C, 1, 3, 3), (1, 1), "SAME",
        feature_group_count=C, dimension_numbers=dn,
    ) + params["b1"].reshape(1, C, 1, 1)
    y = jnp.maximum(y, 0.0)
    y = lax.conv_general_dilated(
        y, params["w2"].reshape(C, 1, 3, 3), (1, 1), "SAME",
        feature_group_count=C, dimension_numbers=dn,
    ) + params["b2"].reshape(1, C, 1, 1)
    y = y * params["layer_scale"].reshape(1, C, 1, 1)
    y = y.reshape(B, C, M)
    idx = jnp.broadcast_to(cell_idx[:, None, :].astype(jnp.int32), (B, C, N))
    gathered = jnp.take_along_axis(y, idx, axis=2)
    return tokens + gathered


if __name__ == "__main__":
    # Small shapes: batch=2, channels=16, points N=300 (padded to 384 -> 3
    # k-tiles), grid 8x16 (M=128 cells).
    B, C, N = 2, 16, 300
    H, W = 8, 16
    M = H * W
    grid_shape = (H, W)

    key = jax.random.PRNGKey(0)
    ks = jax.random.split(key, 11)

    tokens = jax.random.normal(ks[0], (B, C, N), dtype=jnp.float32)

    # Synthetic sp_mat: each point falls in one grid cell; flatten averages.
    cell_idx = jax.random.randint(ks[1], (B, N), 0, M)
    onehot_nm = jax.nn.one_hot(cell_idx, M, dtype=jnp.float32)      # (B, N, M)
    counts = onehot_nm.sum(axis=1, keepdims=True)                   # (B, 1, M)
    flatten = onehot_nm / jnp.maximum(counts, 1.0)

    params = {
        "bn_gamma": 1.0 + 0.1 * jax.random.normal(ks[2], (C,), jnp.float32),
        "bn_beta": 0.1 * jax.random.normal(ks[3], (C,), jnp.float32),
        "bn_mean": 0.1 * jax.random.normal(ks[4], (C,), jnp.float32),
        "bn_var": 0.5 + jnp.abs(jax.random.normal(ks[5], (C,), jnp.float32)),
        "w1": 0.2 * jax.random.normal(ks[6], (C, 3, 3), jnp.float32),
        "b1": 0.1 * jax.random.normal(ks[7], (C,), jnp.float32),
        "w2": 0.2 * jax.random.normal(ks[8], (C, 3, 3), jnp.float32),
        "b2": 0.1 * jax.random.normal(ks[9], (C,), jnp.float32),
        "layer_scale": 0.5 * jax.random.normal(ks[10], (C,), jnp.float32),
    }

    fwd = jax.jit(functools.partial(spatial_mix_forward, grid_shape=grid_shape))
    out = jax.block_until_ready(fwd(tokens, flatten, cell_idx, params))
    assert out.shape == (B, C, N)

    # Tight check vs a reference whose projection uses the same bf16 operands
    # (f32 accumulation) as the kernel.
    ref_bf16 = spatial_mix_reference(tokens, flatten, cell_idx, params,
                                     grid_shape, proj_dtype=jnp.bfloat16)
    err = jnp.max(jnp.abs(out - ref_bf16))
    assert jnp.allclose(out, ref_bf16, atol=2e-3, rtol=2e-3), f"max err {err}"

    # Loose sanity check vs the pure f32 module semantics (gap is bounded by
    # the bf16 rounding of the projection operands only).
    ref_f32 = spatial_mix_reference(tokens, flatten, cell_idx, params, grid_shape)
    err32 = jnp.max(jnp.abs(out - ref_f32))
    assert jnp.allclose(out, ref_f32, atol=1e-1, rtol=5e-2), f"f32 err {err32}"

    print("KERNEL_OK")
</pallas_src>

<mosaic_0001>
module attributes {stable_mosaic.version = 11 : i64} {
  func.func @spatial_mix_kernel(%arg0: i32, %arg1: i32, %arg2: i32, %arg3: memref<1x16x128xbf16, #tpu.memory_space<vmem>>, %arg4: memref<1x128x128xbf16, #tpu.memory_space<vmem>>, %arg5: memref<1x1x128xf32, #tpu.memory_space<vmem>>, %arg6: memref<1x1x384xi32, #tpu.memory_space<vmem>>, %arg7: memref<16x23xf32, #tpu.memory_space<vmem>>, %arg8: memref<9x128xf32, #tpu.memory_space<vmem>>, %arg9: memref<1x16x384xf32, #tpu.memory_space<vmem>>, %arg10: memref<1x16x384xf32, #tpu.memory_space<vmem>>, %arg11: memref<16x128xf32, #tpu.memory_space<vmem>>) attributes {dimension_semantics = [#tpu.dimension_semantics<parallel>, #tpu.dimension_semantics<parallel>, #tpu.dimension_semantics<arbitrary>], iteration_bounds = array<i64: 2, 1, 3>, scalar_prefetch = 0 : i64, scratch_operands = 1 : i64, tpu.core_type = #tpu.core_type<tc>, window_params = [{transform_indices = @transform_0, window_bounds = array<i64: 1, 16, 128>}, {transform_indices = @transform_1, window_bounds = array<i64: 1, 128, 128>}, {transform_indices = @transform_2, window_bounds = array<i64: 1, 1, 128>}, {transform_indices = @transform_3, window_bounds = array<i64: 1, 1, 384>}, {transform_indices = @transform_4, window_bounds = array<i64: 16, 23>}, {pipeline_mode = #tpu.pipeline_mode<synchronous>, transform_indices = @transform_5, window_bounds = array<i64: 9, 128>}, {transform_indices = @transform_6, window_bounds = array<i64: 1, 16, 384>}, {transform_indices = @transform_7, window_bounds = array<i64: 1, 16, 384>}]} {
    %c0_i32 = arith.constant 0 : i32
    %0 = arith.cmpi eq, %arg2, %c0_i32 : i32
    %1 = arith.extui %0 : i1 to i32
    %c0_i32_0 = arith.constant 0 : i32
    %2 = arith.cmpi ne, %1, %c0_i32_0 : i32
    scf.if %2 {
      %cst_11 = arith.constant 0.000000e+00 : f32
      %14 = vector.broadcast %cst_11 : f32 to vector<16x128xf32>
      %c0_12 = arith.constant 0 : index
      %c0_13 = arith.constant 0 : index
      %15 = vector.load %arg11[%c0_12, %c0_13] : memref<16x128xf32, #tpu.memory_space<vmem>>, vector<16x128xf32>
      tpu.vector_store %arg11[%c0_12, %c0_13], %14 {strides = array<i32>} : memref<16x128xf32, #tpu.memory_space<vmem>>, vector<16x128xf32>,
    } else {
    }
    %c0 = arith.constant 0 : index
    %c0_1 = arith.constant 0 : index
    %3 = vector.load %arg11[%c0, %c0_1] : memref<16x128xf32, #tpu.memory_space<vmem>>, vector<16x128xf32>
    %c0_2 = arith.constant 0 : index
    %c0_3 = arith.constant 0 : index
    %c0_4 = arith.constant 0 : index
    %4 = vector.load %arg3[%c0_2, %c0_3, %c0_4] : memref<1x16x128xbf16, #tpu.memory_space<vmem>>, vector<1x16x128xbf16>
    %5 = vector.shape_cast %4 : vector<1x16x128xbf16> to vector<16x128xbf16>
    %c0_5 = arith.constant 0 : index
    %c0_6 = arith.constant 0 : index
    %c0_7 = arith.constant 0 : index
    %6 = vector.load %arg4[%c0_5, %c0_6, %c0_7] : memref<1x128x128xbf16, #tpu.memory_space<vmem>>, vector<1x128x128xbf16>
    %7 = vector.shape_cast %6 : vector<1x128x128xbf16> to vector<128x128xbf16>
    %cst = arith.constant dense<0.000000e+00> : vector<16x128xf32>
    %8 = tpu.matmul %5, %7, %cst {dimension_numbers = #tpu.dot_dimension_numbers<[1], [0], [0], [1], [0, 0, 1, 1], [], []>} : vector<16x128xbf16>, vector<128x128xbf16>, vector<16x128xf32> -> vector<16x128xf32>
    %9 = arith.addf %3, %8 : vector<16x128xf32>
    %c0_8 = arith.constant 0 : index
    %c0_9 = arith.constant 0 : index
    %10 = vector.load %arg11[%c0_8, %c0_9] : memref<16x128xf32, #tpu.memory_space<vmem>>, vector<16x128xf32>
    tpu.vector_store %arg11[%c0_8, %c0_9], %9 {strides = array<i32>} : memref<16x128xf32, #tpu.memory_space<vmem>>, vector<16x128xf32>,
    %c2_i32 = arith.constant 2 : i32
    %11 = arith.cmpi eq, %arg2, %c2_i32 : i32
    %12 = arith.extui %11 : i1 to i32
    %c0_i32_10 = arith.constant 0 : i32
    %13 = arith.cmpi ne, %12, %c0_i32_10 : i32
    scf.if %13 {
      %c0_11 = arith.constant 0 : index
      %c0_12 = arith.constant 0 : index
      %14 = vector.load %arg7[%c0_11, %c0_12] : memref<16x23xf32, #tpu.memory_space<vmem>>, vector<16x23xf32>
      %15 = vector.extract_strided_slice %14 {offsets = [0, 0], sizes = [16, 1], strides = [1, 1]} : vector<16x23xf32> to vector<16x1xf32>
      %16 = vector.extract_strided_slice %14 {offsets = [0, 1], sizes = [16, 1], strides = [1, 1]} : vector<16x23xf32> to vector<16x1xf32>
      %17 = vector.extract_strided_slice %14 {offsets = [0, 2], sizes = [16, 1], strides = [1, 1]} : vector<16x23xf32> to vector<16x1xf32>
      %18 = vector.extract_strided_slice %14 {offsets = [0, 3], sizes = [16, 1], strides = [1, 1]} : vector<16x23xf32> to vector<16x1xf32>
      %19 = vector.extract_strided_slice %14 {offsets = [0, 4], sizes = [16, 1], strides = [1, 1]} : vector<16x23xf32> to vector<16x1xf32>
      %20 = vector.extract_strided_slice %14 {offsets = [0, 5], sizes = [16, 9], strides = [1, 1]} : vector<16x23xf32> to vector<16x9xf32>
      %21 = vector.extract_strided_slice %14 {offsets = [0, 14], sizes = [16, 9], strides = [1, 1]} : vector<16x23xf32> to vector<16x9xf32>
      %c0_13 = arith.constant 0 : index
      %c0_14 = arith.constant 0 : index
      %22 = vector.load %arg8[%c0_13, %c0_14] : memref<9x128xf32, #tpu.memory_space<vmem>>, vector<9x128xf32>
      %c0_15 = arith.constant 0 : index
      %c0_16 = arith.constant 0 : index
      %23 = vector.load %arg11[%c0_15, %c0_16] : memref<16x128xf32, #tpu.memory_space<vmem>>, vector<16x128xf32>
      %24 = vector.broadcast %15 : vector<16x1xf32> to vector<16x128xf32>
      %25 = arith.mulf %23, %24 : vector<16x128xf32>
      %c0_17 = arith.constant 0 : index
      %c0_18 = arith.constant 0 : index
      %c0_19 = arith.constant 0 : index
      %26 = vector.load %arg5[%c0_17, %c0_18, %c0_19] : memref<1x1x128xf32, #tpu.memory_space<vmem>>, vector<1x1x128xf32>
      %27 = vector.shape_cast %26 : vector<1x1x128xf32> to vector<1x128xf32>
      %28 = vector.broadcast %16 : vector<16x1xf32> to vector<16x128xf32>
      %29 = vector.broadcast %27 : vector<1x128xf32> to vector<16x128xf32>
      %30 = arith.mulf %28, %29 : vector<16x128xf32>
      %31 = arith.addf %25, %30 : vector<16x128xf32>
      %c17_i32 = arith.constant 17 : i32
      %32 = tpu.dynamic_rotate %31 by %c17_i32 dim 1 : vector<16x128xf32>, i32 -> vector<16x128xf32>
      %33 = vector.extract_strided_slice %22 {offsets = [0, 0], sizes = [1, 128], strides = [1, 1]} : vector<9x128xf32> to vector<1x128xf32>
      %34 = vector.broadcast %33 : vector<1x128xf32> to vector<16x128xf32>
      %35 = arith.mulf %32, %34 : vector<16x128xf32>
      %36 = vector.extract_strided_slice %20 {offsets = [0, 0], sizes = [16, 1], strides = [1, 1]} : vector<16x9xf32> to vector<16x1xf32>
      %37 = vector.broadcast %36 : vector<16x1xf32> to vector<16x128xf32>
      %38 = arith.mulf %35, %37 : vector<16x128xf32>
      %c16_i32 = arith.constant 16 : i32
      %39 = tpu.dynamic_rotate %31 by %c16_i32 dim 1 : vector<16x128xf32>, i32 -> vector<16x128xf32>
      %40 = vector.extract_strided_slice %22 {offsets = [1, 0], sizes = [1, 128], strides = [1, 1]} : vector<9x128xf32> to vector<1x128xf32>
      %41 = vector.broadcast %40 : vector<1x128xf32> to vector<16x128xf32>
      %42 = arith.mulf %39, %41 : vector<16x128xf32>
      %43 = vector.extract_strided_slice %20 {offsets = [0, 1], sizes = [16, 1], strides = [1, 1]} : vector<16x9xf32> to vector<16x1xf32>
      %44 = vector.broadcast %43 : vector<16x1xf32> to vector<16x128xf32>
      %45 = arith.mulf %42, %44 : vector<16x128xf32>
      %46 = arith.addf %38, %45 : vector<16x128xf32>
      %c15_i32 = arith.constant 15 : i32
      %47 = tpu.dynamic_rotate %31 by %c15_i32 dim 1 : vector<16x128xf32>, i32 -> vector<16x128xf32>
      %48 = vector.extract_strided_slice %22 {offsets = [2, 0], sizes = [1, 128], strides = [1, 1]} : vector<9x128xf32> to vector<1x128xf32>
      %49 = vector.broadcast %48 : vector<1x128xf32> to vector<16x128xf32>
      %50 = arith.mulf %47, %49 : vector<16x128xf32>
      %51 = vector.extract_strided_slice %20 {offsets = [0, 2], sizes = [16, 1], strides = [1, 1]} : vector<16x9xf32> to vector<16x1xf32>
      %52 = vector.broadcast %51 : vector<16x1xf32> to vector<16x128xf32>
      %53 = arith.mulf %50, %52 : vector<16x128xf32>
      %54 = arith.addf %46, %53 : vector<16x128xf32>
      %c1_i32 = arith.constant 1 : i32
      %55 = tpu.dynamic_rotate %31 by %c1_i32 dim 1 : vector<16x128xf32>, i32 -> vector<16x128xf32>
      %56 = vector.extract_strided_slice %22 {offsets = [3, 0], sizes = [1, 128], strides = [1, 1]} : vector<9x128xf32> to vector<1x128xf32>
      %57 = vector.broadcast %56 : vector<1x128xf32> to vector<16x128xf32>
      %58 = arith.mulf %55, %57 : vector<16x128xf32>
      %59 = vector.extract_strided_slice %20 {offsets = [0, 3], sizes = [16, 1], strides = [1, 1]} : vector<16x9xf32> to vector<16x1xf32>
      %60 = vector.broadcast %59 : vector<16x1xf32> to vector<16x128xf32>
      %61 = arith.mulf %58, %60 : vector<16x128xf32>
      %62 = arith.addf %54, %61 : vector<16x128xf32>
      %63 = vector.extract_strided_slice %20 {offsets = [0, 4], sizes = [16, 1], strides = [1, 1]} : vector<16x9xf32> to vector<16x1xf32>
      %64 = vector.broadcast %63 : vector<16x1xf32> to vector<16x128xf32>
      %65 = arith.mulf %31, %64 : vector<16x128xf32>
      %66 = arith.addf %62, %65 : vector<16x128xf32>
      %c127_i32 = arith.constant 127 : i32
      %67 = tpu.dynamic_rotate %31 by %c127_i32 dim 1 : vector<16x128xf32>, i32 -> vector<16x128xf32>
      %68 = vector.extract_strided_slice %22 {offsets = [5, 0], sizes = [1, 128], strides = [1, 1]} : vector<9x128xf32> to vector<1x128xf32>
      %69 = vector.broadcast %68 : vector<1x128xf32> to vector<16x128xf32>
      %70 = arith.mulf %67, %69 : vector<16x128xf32>
      %71 = vector.extract_strided_slice %20 {offsets = [0, 5], sizes = [16, 1], strides = [1, 1]} : vector<16x9xf32> to vector<16x1xf32>
      %72 = vector.broadcast %71 : vector<16x1xf32> to vector<16x128xf32>
      %73 = arith.mulf %70, %72 : vector<16x128xf32>
      %74 = arith.addf %66, %73 : vector<16x128xf32>
      %c113_i32 = arith.constant 113 : i32
      %75 = tpu.dynamic_rotate %31 by %c113_i32 dim 1 : vector<16x128xf32>, i32 -> vector<16x128xf32>
      %76 = vector.extract_strided_slice %22 {offsets = [6, 0], sizes = [1, 128], strides = [1, 1]} : vector<9x128xf32> to vector<1x128xf32>
      %77 = vector.broadcast %76 : vector<1x128xf32> to vector<16x128xf32>
      %78 = arith.mulf %75, %77 : vector<16x128xf32>
      %79 = vector.extract_strided_slice %20 {offsets = [0, 6], sizes = [16, 1], strides = [1, 1]} : vector<16x9xf32> to vector<16x1xf32>
      %80 = vector.broadcast %79 : vector<16x1xf32> to vector<16x128xf32>
      %81 = arith.mulf %78, %80 : vector<16x128xf32>
      %82 = arith.addf %74, %81 : vector<16x128xf32>
      %c112_i32 = arith.constant 112 : i32
      %83 = tpu.dynamic_rotate %31 by %c112_i32 dim 1 : vector<16x128xf32>, i32 -> vector<16x128xf32>
      %84 = vector.extract_strided_slice %22 {offsets = [7, 0], sizes = [1, 128], strides = [1, 1]} : vector<9x128xf32> to vector<1x128xf32>
      %85 = vector.broadcast %84 : vector<1x128xf32> to vector<16x128xf32>
      %86 = arith.mulf %83, %85 : vector<16x128xf32>
      %87 = vector.extract_strided_slice %20 {offsets = [0, 7], sizes = [16, 1], strides = [1, 1]} : vector<16x9xf32> to vector<16x1xf32>
      %88 = vector.broadcast %87 : vector<16x1xf32> to vector<16x128xf32>
      %89 = arith.mulf %86, %88 : vector<16x128xf32>
      %90 = arith.addf %82, %89 : vector<16x128xf32>
      %c111_i32 = arith.constant 111 : i32
      %91 = tpu.dynamic_rotate %31 by %c111_i32 dim 1 : vector<16x128xf32>, i32 -> vector<16x128xf32>
      %92 = vector.extract_strided_slice %22 {offsets = [8, 0], sizes = [1, 128], strides = [1, 1]} : vector<9x128xf32> to vector<1x128xf32>
      %93 = vector.broadcast %92 : vector<1x128xf32> to vector<16x128xf32>
      %94 = arith.mulf %91, %93 : vector<16x128xf32>
      %95 = vector.extract_strided_slice %20 {offsets = [0, 8], sizes = [16, 1], strides = [1, 1]} : vector<16x9xf32> to vector<16x1xf32>
      %96 = vector.broadcast %95 : vector<16x1xf32> to vector<16x128xf32>
      %97 = arith.mulf %94, %96 : vector<16x128xf32>
      %98 = arith.addf %90, %97 : vector<16x128xf32>
      %99 = vector.broadcast %17 : vector<16x1xf32> to vector<16x128xf32>
      %100 = arith.addf %98, %99 : vector<16x128xf32>
      %cst_20 = arith.constant 0.000000e+00 : f32
      %101 = vector.broadcast %cst_20 : f32 to vector<16x128xf32>
      %102 = arith.maximumf %100, %101 : vector<16x128xf32>
      %c17_i32_21 = arith.constant 17 : i32
      %103 = tpu.dynamic_rotate %102 by %c17_i32_21 dim 1 : vector<16x128xf32>, i32 -> vector<16x128xf32>
      %104 = vector.extract_strided_slice %22 {offsets = [0, 0], sizes = [1, 128], strides = [1, 1]} : vector<9x128xf32> to vector<1x128xf32>
      %105 = vector.broadcast %104 : vector<1x128xf32> to vector<16x128xf32>
      %106 = arith.mulf %103, %105 : vector<16x128xf32>
      %107 = vector.extract_strided_slice %21 {offsets = [0, 0], sizes = [16, 1], strides = [1, 1]} : vector<16x9xf32> to vector<16x1xf32>
      %108 = vector.broadcast %107 : vector<16x1xf32> to vector<16x128xf32>
      %109 = arith.mulf %106, %108 : vector<16x128xf32>
      %c16_i32_22 = arith.constant 16 : i32
      %110 = tpu.dynamic_rotate %102 by %c16_i32_22 dim 1 : vector<16x128xf32>, i32 -> vector<16x128xf32>
      %111 = vector.extract_strided_slice %22 {offsets = [1, 0], sizes = [1, 128], strides = [1, 1]} : vector<9x128xf32> to vector<1x128xf32>
      %112 = vector.broadcast %111 : vector<1x128xf32> to vector<16x128xf32>
      %113 = arith.mulf %110, %112 : vector<16x128xf32>
      %114 = vector.extract_strided_slice %21 {offsets = [0, 1], sizes = [16, 1], strides = [1, 1]} : vector<16x9xf32> to vector<16x1xf32>
      %115 = vector.broadcast %114 : vector<16x1xf32> to vector<16x128xf32>
      %116 = arith.mulf %113, %115 : vector<16x128xf32>
      %117 = arith.addf %109, %116 : vector<16x128xf32>
      %c15_i32_23 = arith.constant 15 : i32
      %118 = tpu.dynamic_rotate %102 by %c15_i32_23 dim 1 : vector<16x128xf32>, i32 -> vector<16x128xf32>
      %119 = vector.extract_strided_slice %22 {offsets = [2, 0], sizes = [1, 128], strides = [1, 1]} : vector<9x128xf32> to vector<1x128xf32>
      %120 = vector.broadcast %119 : vector<1x128xf32> to vector<16x128xf32>
      %121 = arith.mulf %118, %120 : vector<16x128xf32>
      %122 = vector.extract_strided_slice %21 {offsets = [0, 2], sizes = [16, 1], strides = [1, 1]} : vector<16x9xf32> to vector<16x1xf32>
      %123 = vector.broadcast %122 : vector<16x1xf32> to vector<16x128xf32>
      %124 = arith.mulf %121, %123 : vector<16x128xf32>
      %125 = arith.addf %117, %124 : vector<16x128xf32>
      %c1_i32_24 = arith.constant 1 : i32
      %126 = tpu.dynamic_rotate %102 by %c1_i32_24 dim 1 : vector<16x128xf32>, i32 -> vector<16x128xf32>
      %127 = vector.extract_strided_slice %22 {offsets = [3, 0], sizes = [1, 128], strides = [1, 1]} : vector<9x128xf32> to vector<1x128xf32>
      %128 = vector.broadcast %127 : vector<1x128xf32> to vector<16x128xf32>
      %129 = arith.mulf %126, %128 : vector<16x128xf32>
      %130 = vector.extract_strided_slice %21 {offsets = [0, 3], sizes = [16, 1], strides = [1, 1]} : vector<16x9xf32> to vector<16x1xf32>
      %131 = vector.broadcast %130 : vector<16x1xf32> to vector<16x128xf32>
      %132 = arith.mulf %129, %131 : vector<16x128xf32>
      %133 = arith.addf %125, %132 : vector<16x128xf32>
      %134 = vector.extract_strided_slice %21 {offsets = [0, 4], sizes = [16, 1], strides = [1, 1]} : vector<16x9xf32> to vector<16x1xf32>
      %135 = vector.broadcast %134 : vector<16x1xf32> to vector<16x128xf32>
      %136 = arith.mulf %102, %135 : vector<16x128xf32>
      %137 = arith.addf %133, %136 : vector<16x128xf32>
      %c127_i32_25 = arith.constant 127 : i32
      %138 = tpu.dynamic_rotate %102 by %c127_i32_25 dim 1 : vector<16x128xf32>, i32 -> vector<16x128xf32>
      %139 = vector.extract_strided_slice %22 {offsets = [5, 0], sizes = [1, 128], strides = [1, 1]} : vector<9x128xf32> to vector<1x128xf32>
      %140 = vector.broadcast %139 : vector<1x128xf32> to vector<16x128xf32>
      %141 = arith.mulf %138, %140 : vector<16x128xf32>
      %142 = vector.extract_strided_slice %21 {offsets = [0, 5], sizes = [16, 1], strides = [1, 1]} : vector<16x9xf32> to vector<16x1xf32>
      %143 = vector.broadcast %142 : vector<16x1xf32> to vector<16x128xf32>
      %144 = arith.mulf %141, %143 : vector<16x128xf32>
      %145 = arith.addf %137, %144 : vector<16x128xf32>
      %c113_i32_26 = arith.constant 113 : i32
      %146 = tpu.dynamic_rotate %102 by %c113_i32_26 dim 1 : vector<16x128xf32>, i32 -> vector<16x128xf32>
      %147 = vector.extract_strided_slice %22 {offsets = [6, 0], sizes = [1, 128], strides = [1, 1]} : vector<9x128xf32> to vector<1x128xf32>
      %148 = vector.broadcast %147 : vector<1x128xf32> to vector<16x128xf32>
      %149 = arith.mulf %146, %148 : vector<16x128xf32>
      %150 = vector.extract_strided_slice %21 {offsets = [0, 6], sizes = [16, 1], strides = [1, 1]} : vector<16x9xf32> to vector<16x1xf32>
      %151 = vector.broadcast %150 : vector<16x1xf32> to vector<16x128xf32>
      %152 = arith.mulf %149, %151 : vector<16x128xf32>
      %153 = arith.addf %145, %152 : vector<16x128xf32>
      %c112_i32_27 = arith.constant 112 : i32
      %154 = tpu.dynamic_rotate %102 by %c112_i32_27 dim 1 : vector<16x128xf32>, i32 -> vector<16x128xf32>
      %155 = vector.extract_strided_slice %22 {offsets = [7, 0], sizes = [1, 128], strides = [1, 1]} : vector<9x128xf32> to vector<1x128xf32>
      %156 = vector.broadcast %155 : vector<1x128xf32> to vector<16x128xf32>
      %157 = arith.mulf %154, %156 : vector<16x128xf32>
      %158 = vector.extract_strided_slice %21 {offsets = [0, 7], sizes = [16, 1], strides = [1, 1]} : vector<16x9xf32> to vector<16x1xf32>
      %159 = vector.broadcast %158 : vector<16x1xf32> to vector<16x128xf32>
      %160 = arith.mulf %157, %159 : vector<16x128xf32>
      %161 = arith.addf %153, %160 : vector<16x128xf32>
      %c111_i32_28 = arith.constant 111 : i32
      %162 = tpu.dynamic_rotate %102 by %c111_i32_28 dim 1 : vector<16x128xf32>, i32 -> vector<16x128xf32>
      %163 = vector.extract_strided_slice %22 {offsets = [8, 0], sizes = [1, 128], strides = [1, 1]} : vector<9x128xf32> to vector<1x128xf32>
      %164 = vector.broadcast %163 : vector<1x128xf32> to vector<16x128xf32>
      %165 = arith.mulf %162, %164 : vector<16x128xf32>
      %166 = vector.extract_strided_slice %21 {offsets = [0, 8], sizes = [16, 1], strides = [1, 1]} : vector<16x9xf32> to vector<16x1xf32>
      %167 = vector.broadcast %166 : vector<16x1xf32> to vector<16x128xf32>
      %168 = arith.mulf %165, %167 : vector<16x128xf32>
      %169 = arith.addf %161, %168 : vector<16x128xf32>
      %170 = vector.broadcast %18 : vector<16x1xf32> to vector<16x128xf32>
      %171 = arith.addf %169, %170 : vector<16x128xf32>
      %172 = vector.broadcast %19 : vector<16x1xf32> to vector<16x128xf32>
      %173 = arith.mulf %171, %172 : vector<16x128xf32>
      %c0_29 = arith.constant 0 : index
      %c0_30 = arith.constant 0 : index
      %c0_31 = arith.constant 0 : index
      %174 = vector.load %arg6[%c0_29, %c0_30, %c0_31] : memref<1x1x384xi32, #tpu.memory_space<vmem>>, vector<1x1x384xi32>
      %175 = vector.shape_cast %174 : vector<1x1x384xi32> to vector<1x384xi32>
      %176 = tpu.iota {dimensions = array<i32: 0>} : vector<128x384xi32>
      %177 = vector.broadcast %175 : vector<1x384xi32> to vector<128x384xi32>
      %178 = arith.cmpi eq, %176, %177 : vector<128x384xi32>
      %179 = arith.extui %178 : vector<128x384xi1> to vector<128x384xi32>
      %180 = arith.sitofp %179 : vector<128x384xi32> to vector<128x384xf32>
      %cst_32 = arith.constant dense<0.000000e+00> : vector<16x384xf32>
      %181 = tpu.matmul %173, %180, %cst_32 {dimension_numbers = #tpu.dot_dimension_numbers<[1], [0], [0], [1], [0, 0, 1, 1], [], []>} : vector<16x128xf32>, vector<128x384xf32>, vector<16x384xf32> -> vector<16x384xf32>
      %c0_33 = arith.constant 0 : index
      %c0_34 = arith.constant 0 : index
      %c0_35 = arith.constant 0 : index
      %182 = vector.load %arg9[%c0_33, %c0_34, %c0_35] : memref<1x16x384xf32, #tpu.memory_space<vmem>>, vector<1x16x384xf32>
      %183 = vector.shape_cast %182 : vector<1x16x384xf32> to vector<16x384xf32>
      %184 = arith.addf %183, %181 : vector<16x384xf32>
      %c0_36 = arith.constant 0 : index
      %c0_37 = arith.constant 0 : index
      %c0_38 = arith.constant 0 : index
      %185 = vector.load %arg10[%c0_36, %c0_37, %c0_38] : memref<1x16x384xf32, #tpu.memory_space<vmem>>, vector<1x16x384xf32>
      %186 = vector.shape_cast %185 : vector<1x16x384xf32> to vector<16x384xf32>
      %187 = vector.shape_cast %184 : vector<16x384xf32> to vector<1x16x384xf32>
      tpu.vector_store %arg10[%c0_36, %c0_37, %c0_38], %187 {strides = array<i32>} : memref<1x16x384xf32, #tpu.memory_space<vmem>>, vector<1x16x384xf32>,
    } else {
    }
    return
  }
  func.func @transform_0(%arg0: i32, %arg1: i32, %arg2: i32) -> (i32, i32, i32) {
    %c0_i32 = arith.constant 0 : i32
    return %arg0, %arg1, %arg2 : i32, i32, i32
  }
  func.func @transform_1(%arg0: i32, %arg1: i32, %arg2: i32) -> (i32, i32, i32) {
    %c0_i32 = arith.constant 0 : i32
    %c0_i32_0 = arith.constant 0 : i32
    return %arg0, %arg2, %c0_i32 : i32, i32, i32
  }
  func.func @transform_2(%arg0: i32, %arg1: i32, %arg2: i32) -> (i32, i32, i32) {
    %c0_i32 = arith.constant 0 : i32
    %c0_i32_0 = arith.constant 0 : i32
    %c0_i32_1 = arith.constant 0 : i32
    return %arg0, %c0_i32, %c0_i32_0 : i32, i32, i32
  }
  func.func @transform_3(%arg0: i32, %arg1: i32, %arg2: i32) -> (i32, i32, i32) {
    %c0_i32 = arith.constant 0 : i32
    %c0_i32_0 = arith.constant 0 : i32
    %c0_i32_1 = arith.constant 0 : i32
    return %arg0, %c0_i32, %c0_i32_0 : i32, i32, i32
  }
  func.func @transform_4(%arg0: i32, %arg1: i32, %arg2: i32) -> (i32, i32) {
    %c0_i32 = arith.constant 0 : i32
    %c0_i32_0 = arith.constant 0 : i32
    return %arg1, %c0_i32 : i32, i32
  }
  func.func @transform_5(%arg0: i32, %arg1: i32, %arg2: i32) -> (i32, i32) {
    %c0_i32 = arith.constant 0 : i32
    %c0_i32_0 = arith.constant 0 : i32
    %c0_i32_1 = arith.constant 0 : i32
    return %c0_i32, %c0_i32_0 : i32, i32
  }
  func.func @transform_6(%arg0: i32, %arg1: i32, %arg2: i32) -> (i32, i32, i32) {
    %c0_i32 = arith.constant 0 : i32
    %c0_i32_0 = arith.constant 0 : i32
    return %arg0, %arg1, %c0_i32 : i32, i32, i32
  }
  func.func @transform_7(%arg0: i32, %arg1: i32, %arg2: i32) -> (i32, i32, i32) {
    %c0_i32 = arith.constant 0 : i32
    %c0_i32_0 = arith.constant 0 : i32
    return %arg0, %arg1, %c0_i32 : i32, i32, i32
  }
}

</mosaic_0001>

<bundles_post_ra>
// kernel: spatial_mix_forward.1
= control target key start
LH: loop header
LB: loop body
LE: loop exit
PB: predicated region body
PF: predicated region fallthrough
CT: control target
= control target key end

     0   :  { %s2670_s0 = inlined_call_operand.vmem [shape: bf16[2,16,384], index: 0, kind: input, shape index: {}]   ;;  %s2671_s1 = inlined_call_operand.vmem [shape: bf16[2,384,128], index: 1, kind: input, shape index: {}]   ;;  %s2672_s2 = inlined_call_operand.vmem [shape: f32[2,1,128], index: 2, kind: input, shape index: {}]   ;;  %s2673_s3 = inlined_call_operand.vmem [shape: s32[2,1,384], index: 3, kind: input, shape index: {}]   ;;  %s2674_s4 = inlined_call_operand.vmem [shape: f32[16,23], index: 4, kind: input, shape index: {}]   ;;  %s2675_s5 = inlined_call_operand.vmem [shape: f32[9,128], index: 5, kind: input, shape index: {}]   ;;  %s2676_s6 = inlined_call_operand.vmem [shape: f32[2,16,384], index: 6, kind: input, shape index: {}, may-alias: {6,7}]   ;;  %s2677_s7 = inlined_call_operand.vmem [shape: f32[2,16,384], index: 7, kind: output, shape index: {}, may-alias: {6,7}]  }
   0x1   :  { %2681 = sst [smem:[#allocation7_spill]] %s2670_s0 }
   0x2   :  { %s2101_s24 = smov 0   ;;  %s2103_s25 = smov 0  }
   0x3   :  { %s2105_s26 = smov 0   ;;  %s2107_s27 = smov 0  }
   0x4   :  { %s2109_s28 = smov 0   ;;  %s2111_s29 = smov 0  }
   0x5   :  { %s2113_s30 = smov 0  }
   0x6 LB: > { %2682 = sst [smem:[#allocation4_spill]] %s2019_s29  ;;  %s29_s8 = sadd.s32 1, %s2015_s28  ;;  %s2023_s30 = sphi %s2113_s30, %s17_s30   ;;  %s2019_s29 = sphi %s2111_s29, %s2689_s29   ;;  %s2015_s28 = sphi %s2109_s28, %s2693_s28   ;;  %s2011_s27 = sphi %s2107_s27, %s2687_s27   ;;  %s2007_s26 = sphi %s2105_s26, %s2692_s26   ;;  %s2003_s25 = sphi %s2103_s25, %s2691_s25   ;;  %s1999_s24 = sphi %s2101_s24, %s2690_s24  }
   0x7   : > { %p30_p0 = scmp.ge.s32.totalorder %s29_s8, 3  ;;  %s36_s9 = sadd.s32 1, %s2019_s29 }
   0x8   : > { %p54_p1 = scmp.ne.s32.totalorder %s2003_s25, %s1999_s24  ;;  %p55_p2 = scmp.eq.s32.totalorder %s2023_s30, 0 }
   0x9   : > { %s2695_s8 = smov (%p30_p0, %s29_s8), 0  ;;  %s2697_s9 = smov (!%p30_p0, %s36_s9), %s2019_s29 }
   0xa   : > { %2683 = sst [smem:[#allocation5_spill]] %s2695_s8  ;;  %p56_p3 = por %p55_p2, %p54_p1 }
   0xb   : > { %p38_p4 = scmp.ge.s32.totalorder %s2697_s9, 2  ;;  %s43_s10 = ssub.s32 %s2015_s28, %s2695_s8 }
   0xc   : > { %s47_s13 = sadd.s32 1, %s2003_s25  ;;  %p1559_p6 = scmp.ge.s32.totalorder %s2023_s30, 6 }
   0xd   : > { %s2699_s9 = smov (%p38_p4, %s2697_s9), 0 }
   0xe   : > { %2684 = sst [smem:[#allocation6_spill]] %s2699_s9  ;;  %s40_s11 = ssub.s32 %s2019_s29, %s2699_s9 }
   0xf   : > { %s44_s12 = sor.u32 %s43_s10, %s40_s11  ;;  %275 = sbr.rel (%p1559_p6) target bundleno = 33 (0x21), region = 24 }
  0x10   : > { %p45_p5 = scmp.eq.s32.totalorder %s44_s12, 0 }
  0x12   : > { %s2152_s14 = scalar_select %p45_p5, %s2003_s25, %s47_s13  }
  0x16   : > { %278 = sbr.rel (!%p56_p3) target bundleno = 33 (0x21), region = 28  ;;  %s280_s15 = sand.u32 (%p56_p3), 1, %s2003_s25  }
  0x17   : > { %s1825_s16 = smul.u32 (%p56_p3), 6, %s2019_s29  ;;  %s1560_s17 = sshll.u32 (%p56_p3), %s280_s15, 3 }
  0x18   : > { %s2685_s0 = sld [smem:[#allocation7_spill]] (%p56_p3)  ;;  %s282_s23 = scalar_lea.vmem (%p56_p3), [#allocation3], %s1560_s17 }
  0x19   : > { %s287_s18 = sadd.s32 (%p56_p3), %s2015_s28, %s1825_s16 }
  0x1a   : > { %s1561_s19 = sshll.u32 (%p56_p3), %s287_s18, 2 }
  0x1e   : > { %s289_s22 = scalar_lea.vmem %s2685_s0, %s1561_s19 }
  0x1f   : > { %v305_v0 = vld [vmem:[%s289_s22] sm:$0xf]  ;;  %v307_v1 = vld [vmem:[%s289_s22 + $0xc] sm:$0xf] }
  0x20   : > { %306 = vst [vmem:[%s282_s23] sm:$0xf] %v305_v0  ;;  %308 = vst [vmem:[%s282_s23 + $0x4] sm:$0xf] %v307_v1 }
  0x21 PF: > { %p1562_p7 = scmp.ge.s32.totalorder %s2023_s30, 1  ;;  %p374_p8 = scmp.lt.s32.totalorder %s2023_s30, 7 }
  0x23   : > { %p375_p9 = pnand %p1562_p7, %p374_p8 }
  0x24   : > { %s381_s10 = sand.u32 (!%p375_p9), 1, %s1999_s24   ;;  %s1564_s11 = sshll.u32 (!%p375_p9), %s2007_s26, 4 }
  0x25   : > { %378 = sbr.rel (%p375_p9) target bundleno = 859 (0x35b), region = 85  ;;  %s2165_s12 = sshll.u32 (!%p375_p9), %s381_s10, 3 }
  0x26   : > { %p450_p10 = scmp.lt.s32.totalorder (!%p375_p9), %s2011_s27, 1  ;;  %p452_p11 = scmp.lt.s32.totalorder (!%p375_p9), %s1564_s11, 47 }
  0x27   : > { %s383_s17 = scalar_lea.vmem (!%p375_p9), [#allocation3], %s2165_s12  ;;  %p1568_p12 = scmp.ne.s32.totalorder (!%p375_p9), %s2007_s26, 0 }
  0x2c   : > { %s2701_s27 = smov (!%p450_p10, %s2011_s27), 1  ;;  %s2703_s11 = smov (!%p452_p11, %s1564_s11), 47 }
  0x2d   : > { %s1826_s13 = smul.u32 48, %s2701_s27  ;;  %v2025_v2 = vmov (!%p1568_p12), 0.0  }
  0x2e   : > { %s1827_s18 = smul.u32 3, %s2701_s27  ;;  %499 = vst [vmem:[#allocation2] sm:$0xff] (!%p1568_p12), %v2025_v2  ;;  %500 = vst [vmem:[#allocation2 + $0x8] sm:$0xff] (!%p1568_p12), %v2025_v2 }
  0x2f   : > { %s455_s19 = sadd.s32 %s1826_s13, %s2703_s11  ;;  %s2180_s21 = scalar_lea.vmem %s2676_s6, %s1826_s13 }
  0x30   : > { %s1565_s22 = sshll.u32 %s455_s19, 2  ;;  %s2185_s0 = scalar_lea.vmem %s2673_s3, %s1827_s18 }
  0x31   : > { %s2190_s29 = scalar_lea.vmem %s2671_s1, %s1565_s22  ;;  %s2195_s11 = scalar_lea.vmem %s2677_s7, %s1826_s13 }
  0x32   : > { %498 = sbr.rel (%p1568_p12) target bundleno = 57 (0x39), region = 93 }
  0x39 PF: > { %v1920_v3 = vld [vmem:[%s2190_s29] sm:$0xff]   ;;  %v2026_v4 = vmov 0.0   ;;  %v1921_v5 = vld [vmem:[%s2190_s29 + $0x8] sm:$0xff]   ;;  %vm2027_vm0 = vmmov 0   ;;  %v1922_v6 = vld [vmem:[%s2190_s29 + $0x10] sm:$0xff]   ;;  %p1578_p13 = scmp.ne.s32.totalorder %s2007_s26, 2 }
  0x3a   : > { %1706 = vmatprep.subr.bf16.mxu0 %v2026_v4  ;;  %1722 = vmatprep.mubr.msk.bf16.mxu0 %vm2027_vm0, %v2026_v4  ;;  %v1923_v7 = vld [vmem:[%s2190_s29 + $0x18] sm:$0xff]   ;;  %v1924_v8 = vld [vmem:[%s2190_s29 + $0x20] sm:$0xff]   ;;  %v1925_v9 = vld [vmem:[%s2190_s29 + $0x28] sm:$0xff]   ;;  %v2028_v23 = vmov (!%p1578_p13), 0   ;;  %v2029_v24 = vmov (!%p1578_p13), 1   ;;  %v2030_v25 = vmov (!%p1578_p13), 5  }
  0x3b   : > { %1707 = vmatpush3.bf16.msra.mxu0 %v1920_v3  ;;  %v1926_v10 = vld [vmem:[%s2190_s29 + $0x30] sm:$0xff]   ;;  %v1927_v11 = vld [vmem:[%s2190_s29 + $0x38] sm:$0xff]   ;;  %v501_v13 = vld [vmem:[#allocation2] sm:$0xff]  ;;  %1931 = vset.pattern.permute.xlu1 (!%p1578_p13), %v2028_v23  ;;  %v2031_v26 = vmov (!%p1578_p13), 6   ;;  %v2032_v27 = vmov (!%p1578_p13), 7   ;;  %v2033_v28 = vmov (!%p1578_p13), 8  }
  0x3c   : > { %1708 = vmatprep.subr.bf16.mxu0 %v2026_v4  ;;  %v1928_v12 = vld [vmem:[%s383_s17] sm:$0xff]   ;;  %v502_v15 = vld [vmem:[#allocation2 + $0x8] sm:$0xff]  ;;  %v2218_v22 = vld [vmem:[%s2674_s4] sm:$0xff] (!%p1578_p13)  ;;  %1929 = vset.pattern.permute.xlu0 (!%p1578_p13), %v2028_v23  ;;  %v2034_v29 = vmov (!%p1578_p13), 9   ;;  %v2035_v30 = vmov (!%p1578_p13), 10   ;;  %v2036_v31 = vmov (!%p1578_p13), 13   ;;  %s2686_s17 = scalar_lea.vmem (!%p1578_p13), %s2672_s2, %s2701_s27 }
  0x3d   : > { %v2213_v21 = vld [vmem:[%s2674_s4 + $0x8] sm:$0xff] (!%p1578_p13)  ;;  %632 = vperm.xlu0 (!%p1578_p13), %1929, %v2218_v22   ;;  %v2037_v32 = vmov (!%p1578_p13), 11   ;;  %v2038_v33 = vmov (!%p1578_p13), 12   ;;  %v2039_v34 = vmov (!%p1578_p13), 15   ;;  %v2040_v35 = vmov (!%p1578_p13), 2   ;;  %s2043_s18 = smov (!%p1578_p13), 16  }
  0x3e   : > { %637 = vperm.xlu1 (!%p1578_p13), %1931, %v2213_v21   ;;  %v2041_v36 = vmov (!%p1578_p13), 14   ;;  %v2042_v37 = vmov (!%p1578_p13), 16   ;;  %v1579_v42 = vld [vmem:[%s2686_s17] ss:$0 sm:$0xff] (!%p1578_p13)  ;;  %s2044_s19 = smov (!%p1578_p13), 17   ;;  %s2045_s27 = smov (!%p1578_p13), 15  }
  0x3f   : > { %1709 = vmatpush3.bf16.msra.mxu0 %v1921_v5  ;;  %s2046_s24 = smov (!%p1578_p13), 127   ;;  %s2047_s20 = smov (!%p1578_p13), 1   ;;  %v2051_v51 = vmov (!%p1578_p13), 17   ;;  %v2052_v53 = vmov (!%p1578_p13), 18   ;;  %v2053_v55 = vmov (!%p1578_p13), 19   ;;  %v2054_v57 = vmov (!%p1578_p13), 22  }
  0x40   : > { %1710 = vmatprep.subr.bf16.mxu0 %v2026_v4  ;;  %s2048_s22 = smov (!%p1578_p13), 113   ;;  %s2049_s23 = smov (!%p1578_p13), 112   ;;  %v2055_v59 = vmov (!%p1578_p13), 20   ;;  %v2056_v60 = vmov (!%p1578_p13), 4   ;;  %v2057_v63 = vmov (!%p1578_p13), 21  }
  0x41   : > { %1930 = vset.pattern.permute.xlu0 (!%p1578_p13), %v2029_v24  ;;  %s2050_s10 = smov (!%p1578_p13), 111  }
  0x42   : > { %1932 = vset.pattern.permute.xlu1 (!%p1578_p13), %v2029_v24  ;;  %644 = vperm.xlu0 (!%p1578_p13), %1930, %v2218_v22  }
  0x43   : > { %1711 = vmatpush3.bf16.msra.mxu0 %v1922_v6  ;;  %648 = vperm.xlu1 (!%p1578_p13), %1932, %v2213_v21   ;;  %v2058_v6 = vmov (!%p1578_p13), 3  }
  0x44   : > { %1712 = vmatprep.subr.bf16.mxu0 %v2026_v4 }
  0x46   : > { %1934 = vset.pattern.permute.xlu0 (!%p1578_p13), %v2031_v26 }
  0x47   : > { %1713 = vmatpush3.bf16.msra.mxu0 %v1923_v7  ;;  %1933 = vset.pattern.permute.xlu1 (!%p1578_p13), %v2030_v25 }
  0x48   : > { %1714 = vmatprep.subr.bf16.mxu0 %v2026_v4  ;;  %672 = vperm.xlu1 (!%p1578_p13), %1933, %v2218_v22  }
  0x49   : > { %692 = vperm.xlu0 (!%p1578_p13), %1934, %v2218_v22  }
  0x4b   : > { %1715 = vmatpush3.bf16.msra.mxu0 %v1924_v8 }
  0x4c   : > { %1716 = vmatprep.subr.bf16.mxu0 %v2026_v4  ;;  %1935 = vset.pattern.permute.xlu1 (!%p1578_p13), %v2032_v27 }
  0x4d   : > { %696 = vperm.xlu0 (!%p1578_p13), %1934, %v2213_v21   ;;  %714 = vperm.xlu1 (!%p1578_p13), %1935, %v2218_v22  }
  0x4f   : > { %1717 = vmatpush3.bf16.msra.mxu0 %v1925_v9 }
  0x50   : > { %1718 = vmatprep.subr.bf16.mxu0 %v2026_v4 }
  0x51   : > { %1938 = vset.pattern.permute.xlu0 (!%p1578_p13), %v2032_v27  ;;  %1936 = vset.pattern.permute.xlu1 (!%p1578_p13), %v2030_v25 }
  0x52   : > { %718 = vperm.xlu0 (!%p1578_p13), %1938, %v2213_v21   ;;  %676 = vperm.xlu1 (!%p1578_p13), %1936, %v2213_v21  }
  0x53   : > { %1719 = vmatpush3.bf16.msra.mxu0 %v1926_v10 }
  0x54   : > { %1720 = vmatprep.subr.bf16.mxu0 %v2026_v4 }
  0x56   : > { %1940 = vset.pattern.permute.xlu0 (!%p1578_p13), %v2033_v28  ;;  %1937 = vset.pattern.permute.xlu1 (!%p1578_p13), %v2033_v28 }
  0x57   : > { %1721 = vmatpush3.bf16.msra.mxu0 %v1927_v11  ;;  %740 = vperm.xlu0 (!%p1578_p13), %1940, %v2213_v21  }
  0x58   : > { %736 = vperm.xlu1 (!%p1578_p13), %1937, %v2218_v22  }
  0x5a   : > { %1723 = vmatmul.mubr.bf16.vlgmr.msra.gmra.mrb[0].mxu0 %v1928_v12 }
  0x5b   : > { %1942 = vset.pattern.permute.xlu0 (!%p1578_p13), %v2034_v29 }
  0x5c   : > { %1939 = vset.pattern.permute.xlu1 (!%p1578_p13), %v2034_v29  ;;  %752 = vperm.xlu0 (!%p1578_p13), %1942, %v2213_v21  }
  0x5d   : > { %748 = vperm.xlu1 (!%p1578_p13), %1939, %v2218_v22  }
  0x60   : > { %1944 = vset.pattern.permute.xlu0 (!%p1578_p13), %v2035_v30 }
  0x61   : > { %1941 = vset.pattern.permute.xlu1 (!%p1578_p13), %v2035_v30  ;;  %774 = vperm.xlu0 (!%p1578_p13), %1944, %v2213_v21  }
  0x62   : > { %770 = vperm.xlu1 (!%p1578_p13), %1941, %v2218_v22  }
  0x65   : > { %1947 = vset.pattern.permute.xlu0 (!%p1578_p13), %v2036_v31 }
  0x66   : > { %1943 = vset.pattern.permute.xlu1 (!%p1578_p13), %v2037_v32  ;;  %836 = vperm.xlu0 (!%p1578_p13), %1947, %v2218_v22  }
  0x67   : > { %792 = vperm.xlu1 (!%p1578_p13), %1943, %v2218_v22  }
  0x6a   : > { %840 = vperm.xlu0 (!%p1578_p13), %1947, %v2213_v21  }
  0x6b   : > { %1945 = vset.pattern.permute.xlu1 (!%p1578_p13), %v2038_v33 }
  0x6c   : > { %814 = vperm.xlu1 (!%p1578_p13), %1945, %v2218_v22  }
  0x6e   : > { %1951 = vset.pattern.permute.xlu0 (!%p1578_p13), %v2039_v34 }
  0x6f   : > { %882 = vperm.xlu0 (!%p1578_p13), %1951, %v2218_v22  }
  0x70   : > { %1946 = vset.pattern.permute.xlu1 (!%p1578_p13), %v2037_v32 }
  0x71   : > { %796 = vperm.xlu1 (!%p1578_p13), %1946, %v2213_v21  }
  0x75   : > { %1948 = vset.pattern.permute.xlu1 (!%p1578_p13), %v2038_v33 }
  0x76   : > { %818 = vperm.xlu1 (!%p1578_p13), %1948, %v2213_v21  }
  0x7a   : > { %1949 = vset.pattern.permute.xlu1 (!%p1578_p13), %v2040_v35 }
  0x7b   : > { %848 = vperm.xlu1 (!%p1578_p13), %1949, %v2218_v22  }
  0x7f   : > { %852 = vperm.xlu1 (!%p1578_p13), %1949, %v2213_v21  }
  0x83   : > { %1950 = vset.pattern.permute.xlu1 (!%p1578_p13), %v2041_v36 }
  0x84   : > { %866 = vperm.xlu1 (!%p1578_p13), %1950, %v2218_v22  }
  0x88   : > { %1952 = vset.pattern.permute.xlu1 (!%p1578_p13), %v2042_v37 }
  0xbc   : > { %v633_v38 = vpop.permute.xlu0 (!%p1578_p13), %632 }
  0xbd   : > { %v638_v39 = vpop.permute.xlu1 (!%p1578_p13), %637 }
  0xc1   : > { %v645_v43 = vpop.permute.xlu0 (!%p1578_p13), %644 }
  0xc2   : > { %v649_v44 = vpop.permute.xlu1 (!%p1578_p13), %648  ;;  %v657_v47 = vmul.f32 (!%p1578_p13), %v1579_v42, %v645_v43 }
  0xc3   : > { %v658_v48 = vmul.f32 (!%p1578_p13), %v1579_v42, %v649_v44 }
  0xc7   : > { %v2291_v52 = vpop.permute.xlu1 (!%p1578_p13), %672 }
  0xc8   : > { %v693_v61 = vpop.permute.xlu0 (!%p1578_p13), %692 }
  0xcc   : > { %v2295_v54 = vpop.permute.xlu1 (!%p1578_p13), %714  ;;  %v2312_v0 = vpop.permute.xlu0 (!%p1578_p13), %696 }
  0xd1   : > { %v2300_v56 = vpop.permute.xlu1 (!%p1578_p13), %676  ;;  %v719_v2 = vpop.permute.xlu0 (!%p1578_p13), %718 }
  0xd6   : > { %v2320_v4 = vpop.permute.xlu0 (!%p1578_p13), %740 }
  0xd7   : > { %v2305_v58 = vpop.permute.xlu1 (!%p1578_p13), %736 }
  0xdb   : > { %v2326_v7 = vpop.permute.xlu0 (!%p1578_p13), %752 }
  0xdc   : > { %v2309_v62 = vpop.permute.xlu1 (!%p1578_p13), %748 }
  0xe0   : > { %v2330_v9 = vpop.permute.xlu0 (!%p1578_p13), %774 }
  0xe1   : > { %v2314_v1 = vpop.permute.xlu1 (!%p1578_p13), %770 }
  0xe5   : > { %v2334_v11 = vpop.permute.xlu0 (!%p1578_p13), %836 }
  0xe6   : > { %v2317_v3 = vpop.permute.xlu1 (!%p1578_p13), %792 }
  0xeb   : > { %v2322_v5 = vpop.permute.xlu1 (!%p1578_p13), %814 }
  0xf0   : > { %v2328_v8 = vpop.permute.xlu1 (!%p1578_p13), %796 }
  0xf5   : > { %v2332_v10 = vpop.permute.xlu1 (!%p1578_p13), %818 }
  0xfa   : > { %v2336_v12 = vpop.permute.xlu1 (!%p1578_p13), %848 }
 0x12c   : > { %623 = sbr.rel (%p1578_p13) target bundleno = 859 (0x35b), region = 97 }
 0x12d   : > { %v609_v14 = vpop.f32.mrb[0].mxu0 }
 0x12e   : > { %v616_v16 = vadd.f32 %v609_v14, %v501_v13  ;;  %v1724_v17 = vpop.f32.mrb[1].mxu0  ;;  %v2338_v13 = vpop.permute.xlu0 (!%p1578_p13), %840  ;;  %v665_v14 = vlaneseq (!%p1578_p13) }
 0x12f   : > { %v612_v18 = vpop.f32.mrb[2].mxu0 }
 0x130   : > { %618 = vst [vmem:[#allocation2] sm:$0xff] %v616_v16  ;;  %v617_v19 = vadd.f32 %v612_v18, %v502_v15  ;;  %v1725_v20 = vpop.f32.mrb[3].mxu0  ;;  %v2340_v15 = vpop.permute.xlu1 (!%p1578_p13), %852  ;;  %v2342_v16 = vshrl.u32 (!%p1578_p13), %v665_v14, 7 }
 0x132   : > { %619 = vst [vmem:[#allocation2 + $0x8] sm:$0xff] %v617_v19  ;;  %v2346_v18 = vpop.permute.xlu0 (!%p1578_p13), %882  ;;  %v687_v19 = vsub.s32 (!%p1578_p13), 1, %v2342_v16  ;;  %v667_v20 = vsub.s32 (!%p1578_p13), 0, %v2342_v16  ;;  %v709_v23 = vsub.s32 (!%p1578_p13), 2, %v2342_v16  ;;  %v731_v33 = vsub.s32 (!%p1578_p13), 3, %v2342_v16 }
 0x134   : > { %v2344_v17 = vpop.permute.xlu1 %866 }
 0x137   : > { %v628_v40 = vld [vmem:[#allocation2] sm:$0xff] }
 0x138   : > { %v640_v45 = vmul.f32 %v633_v38, %v628_v40 }
 0x139   : > { %v629_v41 = vld [vmem:[#allocation2 + $0x8] sm:$0xff] }
 0x13a   : > { %v641_v46 = vmul.f32 %v638_v39, %v629_v41  ;;  %v2251_v49 = vadd.f32 %v657_v47, %v640_v45 }
 0x13c   : > { %v2253_v50 = vadd.f32 %v658_v48, %v641_v46  ;;  %681 = vrot.lane.b32.xlu1 %v2251_v49, %s2043_s18  ;;  %661 = vrot.lane.b32.xlu0 %v2251_v49, %s2044_s19 }
 0x140   : > { %703 = vrot.lane.b32.xlu1 %v2251_v49, %s2045_s27  ;;  %683 = vrot.lane.b32.xlu0 %v2253_v50, %s2043_s18 }
 0x144   : > { %663 = vrot.lane.b32.xlu1 %v2253_v50, %s2044_s19  ;;  %759 = vrot.lane.b32.xlu0 %v2251_v49, %s2046_s24 }
 0x148   : > { %725 = vrot.lane.b32.xlu1 %v2251_v49, %s2047_s20  ;;  %761 = vrot.lane.b32.xlu0 %v2253_v50, %s2046_s24 }
 0x14c   : > { %705 = vrot.lane.b32.xlu1 %v2253_v50, %s2045_s27  ;;  %783 = vrot.lane.b32.xlu0 %v2253_v50, %s2048_s22 }
 0x150   : > { %727 = vrot.lane.b32.xlu1 %v2253_v50, %s2047_s20  ;;  %805 = vrot.lane.b32.xlu0 %v2253_v50, %s2049_s23 }
 0x154   : > { %781 = vrot.lane.b32.xlu1 %v2251_v49, %s2048_s22  ;;  %827 = vrot.lane.b32.xlu0 %v2253_v50, %s2050_s10 }
 0x158   : > { %803 = vrot.lane.b32.xlu1 %v2251_v49, %s2049_s23  ;;  %886 = vperm.xlu0 %1951, %v2213_v21  }
 0x15c   : > { %825 = vrot.lane.b32.xlu1 %v2251_v49, %s2050_s10  ;;  %1955 = vset.pattern.permute.xlu0 %v2042_v37 }
 0x15d   : > { %904 = vperm.xlu0 %1955, %v2213_v21  }
 0x160   : > { %900 = vperm.xlu1 %1952, %v2218_v22  }
 0x161   : > { %1957 = vset.pattern.permute.xlu0 %v2051_v51 }
 0x162   : > { %922 = vperm.xlu0 %1957, %v2213_v21  }
 0x164   : > { %1953 = vset.pattern.permute.xlu1 %v2041_v36 }
 0x165   : > { %870 = vperm.xlu1 %1953, %v2213_v21  }
 0x166   : > { %1959 = vset.pattern.permute.xlu0 %v2052_v53 }
 0x167   : > { %934 = vperm.xlu0 %1959, %v2213_v21  }
 0x169   : > { %1954 = vset.pattern.permute.xlu1 %v2051_v51  ;;  %v765_v51 = vsub.s32 5, %v2342_v16 }
 0x16a   : > { %918 = vperm.xlu1 %1954, %v2218_v22  }
 0x16b   : > { %1961 = vset.pattern.permute.xlu0 %v2053_v55 }
 0x16c   : > { %952 = vperm.xlu0 %1961, %v2213_v21  }
 0x16e   : > { %1956 = vset.pattern.permute.xlu1 %v2052_v53 }
 0x16f   : > { %930 = vperm.xlu1 %1956, %v2218_v22  }
 0x170   : > { %1964 = vset.pattern.permute.xlu0 %v2054_v57 }
 0x171   : > { %1002 = vperm.xlu0 %1964, %v2218_v22  }
 0x173   : > { %1958 = vset.pattern.permute.xlu1 %v2053_v55 }
 0x174   : > { %948 = vperm.xlu1 %1958, %v2218_v22  }
 0x175   : > { %1006 = vperm.xlu0 %1964, %v2213_v21  }
 0x178   : > { %1960 = vset.pattern.permute.xlu1 %v2055_v59 }
 0x179   : > { %966 = vperm.xlu1 %1960, %v2218_v22   ;;  %1967 = vset.pattern.permute.xlu0 %v2056_v60 }
 0x17a   : > { %1024 = vperm.xlu0 %1967, %v2218_v22  }
 0x17d   : > { %1962 = vset.pattern.permute.xlu1 %v2057_v63 }
 0x17e   : > { %984 = vperm.xlu1 %1962, %v2218_v22  }
 0x182   : > { %1963 = vset.pattern.permute.xlu1 %v2055_v59 }
 0x183   : > { %970 = vperm.xlu1 %1963, %v2213_v21  }
 0x187   : > { %1965 = vset.pattern.permute.xlu1 %v2057_v63 }
 0x188   : > { %988 = vperm.xlu1 %1965, %v2213_v21  }
 0x18c   : > { %1966 = vset.pattern.permute.xlu1 %v2058_v6 }
 0x18d   : > { %1014 = vperm.xlu1 %1966, %v2218_v22   ;;  %v626_v22 = vld [vmem:[%s2675_s5] sm:$0xff] }
 0x18e   : > { %v2356_v26 = vrot.slane %v626_v22, %v687_v19  ;;  %v2360_v27 = vrot.slane %v626_v22, %v667_v20  ;;  %v2364_v28 = vrot.slane %v626_v22, %v709_v23  ;;  %v2371_v39 = vrot.slane %v626_v22, %v731_v33 }
 0x18f   : > { %v2386_v14 = vrot.slane %v626_v22, %v765_v51  ;;  %v756_v33 = vmul.f32 %v2326_v7, %v2253_v50 }
 0x191   : > { %1018 = vperm.xlu1 %1966, %v2213_v21  }
 0x195   : > { %1968 = vset.pattern.permute.xlu1 %v2056_v60 }
 0x1ae   : > { %v682_v24 = vpop.permute.xlu1 %681  ;;  %v662_v25 = vpop.permute.xlu0 %661 }
 0x1af   : > { %v689_v31 = vmul.f32 %v2356_v26, %v682_v24  ;;  %v669_v32 = vmul.f32 %v2360_v27, %v662_v25 }
 0x1b1   : > { %v699_v37 = vmul.f32 %v693_v61, %v689_v31  ;;  %v679_v38 = vmul.f32 %v2291_v52, %v669_v32  ;;  %v787_v52 = vsub.s32 6, %v2342_v16 }
 0x1b2   : > { %v704_v29 = vpop.permute.xlu1 %703  ;;  %v684_v30 = vpop.permute.xlu0 %683 }
 0x1b3   : > { %v711_v34 = vmul.f32 %v2364_v28, %v704_v29  ;;  %v701_v43 = vadd.f32 %v699_v37, %v679_v38  ;;  %v690_v47 = vmul.f32 %v2356_v26, %v684_v30  ;;  %v2388_v29 = vrot.slane %v626_v22, %v787_v52 }
 0x1b5   : > { %v721_v40 = vmul.f32 %v2295_v54, %v711_v34  ;;  %v755_v54 = vmul.f32 %v2309_v62, %v2251_v49  ;;  %v700_v61 = vmul.f32 %v2312_v0, %v690_v47 }
 0x1b6   : > { %v664_v35 = vpop.permute.xlu1 %663  ;;  %v760_v36 = vpop.permute.xlu0 %759 }
 0x1b7   : > { %v670_v44 = vmul.f32 %v2360_v27, %v664_v35  ;;  %v723_v46 = vadd.f32 %v721_v40, %v701_v43  ;;  %v767_v0 = vmul.f32 %v2386_v14, %v760_v36 }
 0x1b9   : > { %v680_v57 = vmul.f32 %v2300_v56, %v670_v44 }
 0x1ba   : > { %v726_v41 = vpop.permute.xlu1 %725  ;;  %v762_v42 = vpop.permute.xlu0 %761 }
 0x1bb   : > { %v733_v45 = vmul.f32 %v2371_v39, %v726_v41  ;;  %v702_v25 = vadd.f32 %v700_v61, %v680_v57  ;;  %v768_v56 = vmul.f32 %v2386_v14, %v762_v42 }
 0x1bd   : > { %v743_v48 = vmul.f32 %v2305_v58, %v733_v45  ;;  %v809_v58 = vsub.s32 7, %v2342_v16  ;;  %v778_v38 = vmul.f32 %v2330_v9, %v768_v56  ;;  %v1033_v45 = vld [vmem:[%s2185_s0] sm:$0x7]  ;;  %v1046_v56 = vadd.s32 88, %v2342_v16 }
 0x1be   : > { %v706_v53 = vpop.permute.xlu1 %705  ;;  %v784_v55 = vpop.permute.xlu0 %783 }
 0x1bf   : > { %v745_v59 = vadd.f32 %v743_v48, %v723_v46  ;;  %v712_v60 = vmul.f32 %v2364_v28, %v706_v53  ;;  %v2393_v32 = vrot.slane %v626_v22, %v809_v58  ;;  %v790_v34 = vmul.f32 %v2388_v29, %v784_v55  ;;  %v2406_v22 = vld [vmem:[%s2675_s5 + $0x8] ss:$0 sm:$0xff] }
 0x1c0   : > { %v2465_v58 = vrot.slane %v1033_v45, %v709_v23  ;;  %v2480_v23 = vadd.s32 56, %v2342_v16 }
 0x1c1   : > { %v757_v63 = vadd.f32 %v755_v54, %v745_v59  ;;  %v722_v6 = vmul.f32 %v719_v2, %v712_v60  ;;  %v800_v7 = vmul.f32 %v2328_v8, %v790_v34  ;;  %v2418_v8 = vrot.slane %v1033_v45, %v687_v19 }
 0x1c2   : > { %v728_v24 = vpop.permute.xlu1 %727  ;;  %v806_v49 = vpop.permute.xlu0 %805 }
 0x1c3   : > { %v734_v30 = vmul.f32 %v2371_v39, %v728_v24  ;;  %v724_v62 = vadd.f32 %v722_v6, %v702_v25  ;;  %v812_v41 = vmul.f32 %v2393_v32, %v806_v49  ;;  %vm1064_vm1 = vcmp.eq.s32.totalorder %v2342_v16, %v2418_v8 }
 0x1c4   : > { %v2477_v24 = vadd.s32 48, %v2342_v16  ;;  %v2500_v25 = vadd.s32 64, %v2342_v16  ;;  %v1045_v49 = vadd.s32 80, %v2342_v16 }
 0x1c5   : > { %v744_v31 = vmul.f32 %v2320_v4, %v734_v30  ;;  %v777_v4 = vmul.f32 %v2314_v1, %v767_v0  ;;  %v822_v47 = vmul.f32 %v2332_v10, %v812_v41  ;;  %v2503_v30 = vadd.s32 72, %v2342_v16 }
 0x1c6   : > { %v782_v2 = vpop.permute.xlu1 %781  ;;  %v828_v36 = vpop.permute.xlu0 %827  ;;  %v1049_v0 = vadd.s32 112, %v2342_v16 }
 0x1c7   : > { %v746_v35 = vadd.f32 %v744_v31, %v724_v62  ;;  %v789_v37 = vmul.f32 %v2388_v29, %v782_v2  ;;  %v779_v9 = vadd.f32 %v777_v4, %v757_v63  ;;  %v834_v1 = vmul.f32 %v2406_v22, %v828_v36 }
 0x1c8   : > { %v1047_v62 = vadd.s32 96, %v2342_v16  ;;  %v1048_v31 = vadd.s32 104, %v2342_v16  ;;  %v1050_v2 = vadd.s32 120, %v2342_v16 }
 0x1c9   : > { %v758_v40 = vadd.f32 %v756_v33, %v746_v35  ;;  %v799_v43 = vmul.f32 %v2317_v3, %v789_v37  ;;  %v2422_v3 = vrot.slane %v1033_v45, %v667_v20  ;;  %v844_v54 = vmul.f32 %v2338_v13, %v834_v1 }
 0x1ca   : > { %v804_v50 = vpop.permute.xlu1 %803  ;;  %v2059_v20 = vmov 1.0|1.0   ;;  %v1038_v13 = vadd.s32 24, %v2342_v16 }
 0x1cb   : > { %v780_v42 = vadd.f32 %v778_v38, %v758_v40  ;;  %v811_v44 = vmul.f32 %v2393_v32, %v804_v50  ;;  %v801_v52 = vadd.f32 %v799_v43, %v779_v9  ;;  %vm1063_vm4 = vcmp.eq.s32.totalorder %v2342_v16, %v2422_v3 }
 0x1cc   : > { %vm1073_vm8 = vcmp.eq.s32.totalorder %v1038_v13, %v2418_v8  ;;  %vm1072_vm11 = vcmp.eq.s32.totalorder %v1038_v13, %v2422_v3 }
 0x1cd   : > { %v802_v46 = vadd.f32 %v800_v7, %v780_v42  ;;  %v821_v48 = vmul.f32 %v2322_v5, %v811_v44  ;;  %v1036_v5 = vadd.s32 8, %v2342_v16 }
 0x1ce   : > { %v826_v51 = vpop.permute.xlu1 %825 }
 0x1cf   : > { %v824_v53 = vadd.f32 %v822_v47, %v802_v46  ;;  %v833_v55 = vmul.f32 %v2406_v22, %v826_v51  ;;  %v823_v10 = vadd.f32 %v821_v48, %v801_v52  ;;  %vm1067_vm2 = vcmp.eq.s32.totalorder %v1036_v5, %v2418_v8 }
 0x1d0   : > { %vm1761_vm3 = vmpackc.low %vm1067_vm2, %vm1064_vm1  ;;  %vm1066_vm5 = vcmp.eq.s32.totalorder %v1036_v5, %v2422_v3 }
 0x1d1   : > { %v843_v57 = vmul.f32 %v2334_v11, %v833_v55  ;;  %v846_v59 = vadd.f32 %v844_v54, %v824_v53  ;;  %1762 = vmatprep.subr.msk.bf16.mxu0 %vm1761_vm3, %v2059_v20  ;;  %v1037_v11 = vadd.s32 16, %v2342_v16  ;;  %vm1763_vm6 = vmpackc.low %vm1066_vm5, %vm1063_vm4  ;;  %vm1082_vm3 = vcmp.eq.s32.totalorder %v2477_v24, %v2418_v8 }
 0x1d2   : > { %1764 = vmatpush1.bf16.msk.msra.mxu0 %vm1763_vm6, %v2059_v20  ;;  %vm1085_vm4 = vcmp.eq.s32.totalorder %v2480_v23, %v2418_v8  ;;  %vm1081_vm6 = vcmp.eq.s32.totalorder %v2477_v24, %v2422_v3 }
 0x1d3   : > { %v845_v60 = vadd.f32 %v843_v57, %v823_v10  ;;  %v856_v61 = vadd.f32 %v2340_v15, %v846_v59  ;;  %vm1070_vm7 = vcmp.eq.s32.totalorder %v1037_v11, %v2418_v8  ;;  %vm1069_vm10 = vcmp.eq.s32.totalorder %v1037_v11, %v2422_v3  ;;  %vm1773_vm5 = vmpackc.low %vm1085_vm4, %vm1082_vm3 }
 0x1d4   : > { %vm1765_vm9 = vmpackc.low %vm1073_vm8, %vm1070_vm7  ;;  %v2454_v15 = vadd.s32 40, %v2342_v16  ;;  %vm1084_vm7 = vcmp.eq.s32.totalorder %v2480_v23, %v2422_v3  ;;  %vm1065_vm8 = vcmp.eq.s32.totalorder %v2342_v16, %v2465_v58  ;;  %vm1074_vm3 = vcmp.eq.s32.totalorder %v1038_v13, %v2465_v58 }
 0x1d5   : > { %v855_v19 = vadd.f32 %v2336_v12, %v845_v60  ;;  %1766 = vmatprep.subr.msk.bf16.mxu0 %vm1765_vm9, %v2059_v20  ;;  %vm1767_vm12 = vmpackc.low %vm1072_vm11, %vm1069_vm10  ;;  %v2451_v12 = vadd.s32 32, %v2342_v16  ;;  %v2456_v6 = vmax.f32 %v856_v61, 0.0  ;;  %vm1068_vm10 = vcmp.eq.s32.totalorder %v1036_v5, %v2465_v58 }
 0x1d6   : > { %1768 = vmatpush1.bf16.msk.msra.mxu0 %vm1767_vm12, %v2059_v20  ;;  %vm1079_vm14 = vcmp.eq.s32.totalorder %v2454_v15, %v2418_v8  ;;  %vm1078_vm1 = vcmp.eq.s32.totalorder %v2454_v15, %v2422_v3  ;;  %vm1775_vm9 = vmpackc.low %vm1084_vm7, %vm1081_vm6  ;;  %vm1088_vm12 = vcmp.eq.s32.totalorder %v2500_v25, %v2418_v8  ;;  %vm1097_vm6 = vcmp.eq.s32.totalorder %v1046_v56, %v2418_v8 }
 0x1d7   : > { %v2438_v63 = vmax.f32 %v855_v19, 0.0  ;;  %vm1076_vm13 = vcmp.eq.s32.totalorder %v2451_v12, %v2418_v8  ;;  %vm1075_vm0 = vcmp.eq.s32.totalorder %v2451_v12, %v2422_v3  ;;  %vm1793_vm11 = vmpackc.low %vm1068_vm10, %vm1065_vm8  ;;  %vm1093_vm8 = vcmp.eq.s32.totalorder %v1045_v49, %v2422_v3  ;;  %v887_v38 = vpop.permute.xlu0 %886 }
 0x1d8   : > { %vm1769_vm15 = vmpackc.low %vm1079_vm14, %vm1076_vm13  ;;  %1794 = vmatprep.subr.msk.bf16.mxu1 %vm1793_vm11, %v2059_v20  ;;  %vm1091_vm13 = vcmp.eq.s32.totalorder %v2503_v30, %v2418_v8  ;;  %vm1077_vm10 = vcmp.eq.s32.totalorder %v2451_v12, %v2465_v58  ;;  %v2060_v16 = vmov 0.0  }
 0x1d9   : > { %875 = vrot.lane.b32.xlu1 %v2438_v63, %s2043_s18  ;;  %859 = vrot.lane.b32.xlu0 %v2438_v63, %s2044_s19  ;;  %vm1771_vm2 = vmpackc.low %vm1078_vm1, %vm1075_vm0  ;;  %vm1090_vm0 = vcmp.eq.s32.totalorder %v2503_v30, %v2422_v3  ;;  %vm1071_vm1 = vcmp.eq.s32.totalorder %v1037_v11, %v2465_v58 }
 0x1da   : > { %1770 = vmatprep.subr.msk.bf16.mxu0 %vm1769_vm15, %v2059_v20  ;;  %vm1777_vm14 = vmpackc.low %vm1091_vm13, %vm1088_vm12  ;;  %vm1087_vm15 = vcmp.eq.s32.totalorder %v2500_v25, %v2422_v3  ;;  %1796 = vmatpush3.bf16.msk.msra.mxu1 %vm1793_vm11, %v2059_v20  ;;  %vm1080_vm12 = vcmp.eq.s32.totalorder %v2454_v15, %v2465_v58 }
 0x1db   : > { %1772 = vmatpush1.bf16.msk.msra.mxu0 %vm1771_vm2, %v2059_v20  ;;  %vm1779_vm2 = vmpackc.low %vm1090_vm0, %vm1087_vm15  ;;  %vm1103_vm15 = vcmp.eq.s32.totalorder %v1048_v31, %v2418_v8  ;;  %1271 = vmatprep.mubr.f32.mxu0 %v2060_v16 }
 0x1dc   : > { %1774 = vmatprep.subr.msk.bf16.mxu0 %vm1773_vm5, %v2059_v20  ;;  %vm1797_vm4 = vmpackc.low %vm1074_vm3, %vm1071_vm1  ;;  %vm1094_vm5 = vcmp.eq.s32.totalorder %v1045_v49, %v2418_v8  ;;  %vm1099_vm1 = vcmp.eq.s32.totalorder %v1047_v62, %v2422_v3  ;;  %vm1083_vm3 = vcmp.eq.s32.totalorder %v2477_v24, %v2465_v58  ;;  %v905_v41 = vpop.permute.xlu0 %904 }
 0x1dd   : > { %893 = vrot.lane.b32.xlu1 %v2438_v63, %s2045_s27  ;;  %877 = vrot.lane.b32.xlu0 %v2456_v6, %s2043_s18  ;;  %vm1781_vm7 = vmpackc.low %vm1097_vm6, %vm1094_vm5  ;;  %vm1086_vm5 = vcmp.eq.s32.totalorder %v2480_v23, %v2465_v58 }
 0x1de   : > { %1798 = vmatprep.subr.msk.bf16.mxu1 %vm1797_vm4, %v2059_v20  ;;  %vm1801_vm13 = vmpackc.low %vm1080_vm12, %vm1077_vm10  ;;  %vm1105_vm10 = vcmp.eq.s32.totalorder %v1049_v0, %v2422_v3  ;;  %vm1089_vm12 = vcmp.eq.s32.totalorder %v2500_v25, %v2465_v58 }
 0x1df   : > { %1776 = vmatpush1.bf16.msk.msra.mxu0 %vm1775_vm9, %v2059_v20  ;;  %vm1096_vm9 = vcmp.eq.s32.totalorder %v1046_v56, %v2422_v3  ;;  %1800 = vmatpush3.bf16.msk.msra.mxu1 %vm1797_vm4, %v2059_v20  ;;  %vm1805_vm6 = vmpackc.low %vm1086_vm5, %vm1083_vm3  ;;  %vm1101_vm3 = vcmp.eq.s32.totalorder %v1047_v62, %v2465_v58  ;;  %v901_v33 = vpop.permute.xlu1 %900 }
 0x1e0   : > { %1778 = vmatprep.subr.msk.bf16.mxu0 %vm1777_vm14, %v2059_v20  ;;  %vm1783_vm11 = vmpackc.low %vm1096_vm9, %vm1093_vm8  ;;  %1802 = vmatprep.subr.msk.bf16.mxu1 %vm1801_vm13, %v2059_v20  ;;  %vm1100_vm14 = vcmp.eq.s32.totalorder %v1047_v62, %v2418_v8  ;;  %vm1109_vm8 = vcmp.eq.s32.totalorder %v1050_v2, %v2418_v8 }
 0x1e1   : > { %941 = vrot.lane.b32.xlu0 %v2438_v63, %s2046_s24  ;;  %861 = vrot.lane.b32.xlu1 %v2456_v6, %s2044_s19  ;;  %vm1785_vm0 = vmpackc.low %vm1103_vm15, %vm1100_vm14  ;;  %v923_v36 = vpop.permute.xlu0 %922 }
 0x1e3   : > { %1780 = vmatpush1.bf16.msk.msra.mxu0 %vm1779_vm2, %v2059_v20  ;;  %vm1102_vm2 = vcmp.eq.s32.totalorder %v1048_v31, %v2422_v3  ;;  %1804 = vmatpush3.bf16.msk.msra.mxu1 %vm1801_vm13, %v2059_v20  ;;  %vm1092_vm13 = vcmp.eq.s32.totalorder %v2503_v30, %v2465_v58 }
 0x1e4   : > { %1782 = vmatprep.subr.msk.bf16.mxu0 %vm1781_vm7, %v2059_v20  ;;  %vm1787_vm4 = vmpackc.low %vm1102_vm2, %vm1099_vm1  ;;  %1806 = vmatprep.subr.msk.bf16.mxu1 %vm1805_vm6, %v2059_v20  ;;  %vm1106_vm7 = vcmp.eq.s32.totalorder %v1049_v0, %v2418_v8  ;;  %vm1098_vm1 = vcmp.eq.s32.totalorder %v1046_v56, %v2465_v58  ;;  %v871_v34 = vpop.permute.xlu1 %870 }
 0x1e5   : > { %943 = vrot.lane.b32.xlu0 %v2456_v6, %s2046_s24  ;;  %911 = vrot.lane.b32.xlu1 %v2438_v63, %s2047_s20  ;;  %vm1789_vm9 = vmpackc.low %vm1109_vm8, %vm1106_vm7  ;;  %vm1110_vm7 = vcmp.eq.s32.totalorder %v1050_v2, %v2465_v58 }
 0x1e6   : > { %vm1809_vm15 = vmpackc.low %vm1092_vm13, %vm1089_vm12  ;;  %v935_v7 = vpop.permute.xlu0 %934 }
 0x1e7   : > { %1784 = vmatpush1.bf16.msk.msra.mxu0 %vm1783_vm11, %v2059_v20  ;;  %vm1108_vm11 = vcmp.eq.s32.totalorder %v1050_v2, %v2422_v3  ;;  %1808 = vmatpush3.bf16.msk.msra.mxu1 %vm1805_vm6, %v2059_v20  ;;  %vm1107_vm6 = vcmp.eq.s32.totalorder %v1049_v0, %v2465_v58 }
 0x1e8   : > { %1786 = vmatprep.subr.msk.bf16.mxu0 %vm1785_vm0, %v2059_v20  ;;  %vm1791_vm14 = vmpackc.low %vm1108_vm11, %vm1105_vm10  ;;  %1810 = vmatprep.subr.msk.bf16.mxu1 %vm1809_vm15, %v2059_v20  ;;  %vm1095_vm0 = vcmp.eq.s32.totalorder %v1045_v49, %v2465_v58 }
 0x1e9   : > { %961 = vrot.lane.b32.xlu0 %v2456_v6, %s2048_s22  ;;  %895 = vrot.lane.b32.xlu1 %v2456_v6, %s2045_s27  ;;  %vm1813_vm2 = vmpackc.low %vm1098_vm1, %vm1095_vm0  ;;  %v919_v35 = vpop.permute.xlu1 %918 }
 0x1ea   : > { %vm1821_vm8 = vmpackc.low %vm1110_vm7, %vm1107_vm6 }
 0x1eb   : > { %1788 = vmatpush1.bf16.msk.msra.mxu0 %vm1787_vm4, %v2059_v20  ;;  %1812 = vmatpush3.bf16.msk.msra.mxu1 %vm1809_vm15, %v2059_v20  ;;  %vm1104_vm4 = vcmp.eq.s32.totalorder %v1048_v31, %v2465_v58  ;;  %v953_v43 = vpop.permute.xlu0 %952 }
 0x1ec   : > { %1790 = vmatprep.subr.msk.bf16.mxu0 %vm1789_vm9, %v2059_v20  ;;  %1814 = vmatprep.subr.msk.bf16.mxu1 %vm1813_vm2, %v2059_v20  ;;  %vm1817_vm5 = vmpackc.low %vm1104_vm4, %vm1101_vm3 }
 0x1ed   : > { %997 = vrot.lane.b32.xlu0 %v2456_v6, %s2050_s10  ;;  %913 = vrot.lane.b32.xlu1 %v2456_v6, %s2047_s20 }
 0x1ee   : > { %v931_v37 = vpop.permute.xlu1 %930 }
 0x1ef   : > { %1792 = vmatpush1.bf16.msk.msra.mxu0 %vm1791_vm14, %v2059_v20  ;;  %1816 = vmatpush3.bf16.msk.msra.mxu1 %vm1813_vm2, %v2059_v20  ;;  %v937_v13 = vmul.f32 %v931_v37, %v2438_v63 }
 0x1f0   : > { %1818 = vmatprep.subr.msk.bf16.mxu1 %vm1817_vm5, %v2059_v20  ;;  %v1003_v9 = vpop.permute.xlu0 %1002 }
 0x1f1   : > { %959 = vrot.lane.b32.xlu1 %v2438_v63, %s2048_s22 }
 0x1f3   : > { %1820 = vmatpush3.bf16.msk.msra.mxu1 %vm1817_vm5, %v2059_v20  ;;  %v949_v40 = vpop.permute.xlu1 %948 }
 0x1f4   : > { %1822 = vmatprep.subr.msk.bf16.mxu1 %vm1821_vm8, %v2059_v20  ;;  %v2604_v45 = vpop.permute.xlu0 %1006 }
 0x1f5   : > { %977 = vrot.lane.b32.xlu1 %v2438_v63, %s2049_s23 }
 0x1f7   : > { %1824 = vmatpush3.bf16.msk.msra.mxu1 %vm1821_vm8, %v2059_v20 }
 0x1f8   : > { %v967_v4 = vpop.permute.xlu1 %966 }
 0x1f9   : > { %995 = vrot.lane.b32.xlu1 %v2438_v63, %s2050_s10  ;;  %v2608_v47 = vpop.permute.xlu0 %1024 }
 0x1fd   : > { %979 = vrot.lane.b32.xlu1 %v2456_v6, %s2049_s23  ;;  %v985_v50 = vpop.permute.xlu1 %984 }
 0x201   : > { %1028 = vperm.xlu1 %1968, %v2213_v21  }
 0x202   : > { %v2598_v42 = vpop.permute.xlu1 %970 }
 0x207   : > { %v2600_v44 = vpop.permute.xlu1 %988 }
 0x20c   : > { %v2602_v21 = vpop.permute.xlu1 %1014 }
 0x210   : > { %v2606_v46 = vpop.permute.xlu1 %1018 }
 0x24b   : > { %v876_v1 = vpop.permute.xlu1 %875  ;;  %v860_v48 = vpop.permute.xlu0 %859 }
 0x24c   : > { %v879_v53 = vmul.f32 %v876_v1, %v2356_v26  ;;  %v863_v52 = vmul.f32 %v860_v48, %v2360_v27 }
 0x24e   : > { %v889_v3 = vmul.f32 %v2346_v18, %v879_v53  ;;  %v873_v54 = vmul.f32 %v2344_v17, %v863_v52 }
 0x24f   : > { %v894_v51 = vpop.permute.xlu1 %893  ;;  %v878_v19 = vpop.permute.xlu0 %877 }
 0x250   : > { %v897_v55 = vmul.f32 %v894_v51, %v2364_v28  ;;  %v891_v5 = vadd.f32 %v889_v3, %v873_v54  ;;  %v880_v58 = vmul.f32 %v878_v19, %v2356_v26  ;;  %v1364_v19 = vld [vmem:[%s2180_s21 + $0x28] sm:$0xff] }
 0x252   : > { %v907_v10 = vmul.f32 %v901_v33, %v897_v55  ;;  %v890_v30 = vmul.f32 %v887_v38, %v880_v58 }
 0x253   : > { %v862_v8 = vpop.permute.xlu1 %861  ;;  %v942_v24 = vpop.permute.xlu0 %941 }
 0x254   : > { %v909_v60 = vadd.f32 %v907_v10, %v891_v5  ;;  %v864_v12 = vmul.f32 %v862_v8, %v2360_v27  ;;  %v945_v62 = vmul.f32 %v942_v24, %v2386_v14  ;;  %v1360_v5 = vld [vmem:[%s2180_s21 + $0x8] sm:$0xff] }
 0x256   : > { %v874_v23 = vmul.f32 %v871_v34, %v864_v12  ;;  %v955_v26 = vmul.f32 %v949_v40, %v945_v62 }
 0x257   : > { %v912_v57 = vpop.permute.xlu1 %911  ;;  %v944_v27 = vpop.permute.xlu0 %943 }
 0x258   : > { %v915_v59 = vmul.f32 %v912_v57, %v2371_v39  ;;  %v892_v31 = vadd.f32 %v890_v30, %v874_v23  ;;  %v946_v38 = vmul.f32 %v944_v27, %v2386_v14 }
 0x25a   : > { %v925_v20 = vmul.f32 %v919_v35, %v915_v59  ;;  %v956_v8 = vmul.f32 %v953_v43, %v946_v38  ;;  %v1362_v59 = vld [vmem:[%s2180_s21 + $0x18] sm:$0xff] }
 0x25b   : > { %v896_v11 = vpop.permute.xlu1 %895  ;;  %v962_v48 = vpop.permute.xlu0 %961 }
 0x25c   : > { %v927_v61 = vadd.f32 %v925_v20, %v909_v60  ;;  %v898_v18 = vmul.f32 %v896_v11, %v2364_v28  ;;  %v964_v40 = vmul.f32 %v962_v48, %v2388_v29  ;;  %v1363_v20 = vld [vmem:[%s2180_s21 + $0x20] sm:$0xff] }
 0x25e   : > { %v939_v15 = vadd.f32 %v937_v13, %v927_v61  ;;  %v908_v49 = vmul.f32 %v905_v41, %v898_v18  ;;  %v974_v14 = vmul.f32 %v2598_v42, %v964_v40 }
 0x25f   : > { %v914_v17 = vpop.permute.xlu1 %913  ;;  %v998_v10 = vpop.permute.xlu0 %997 }
 0x260   : > { %v916_v25 = vmul.f32 %v914_v17, %v2371_v39  ;;  %v910_v2 = vadd.f32 %v908_v49, %v892_v31  ;;  %v957_v34 = vadd.f32 %v955_v26, %v939_v15  ;;  %v938_v39 = vmul.f32 %v935_v7, %v2456_v6 }
 0x261   : > { %v1000_v43 = vmul.f32 %v2406_v22, %v998_v10 }
 0x262   : > { %v926_v0 = vmul.f32 %v923_v36, %v916_v25 }
 0x263   : > { %v960_v56 = vpop.permute.xlu1 %959  ;;  %v1010_v42 = vmul.f32 %v2604_v45, %v1000_v43 }
 0x264   : > { %v963_v63 = vmul.f32 %v960_v56, %v2388_v29  ;;  %v928_v37 = vadd.f32 %v926_v0, %v910_v2 }
 0x266   : > { %v973_v35 = vmul.f32 %v967_v4, %v963_v63  ;;  %v940_v36 = vadd.f32 %v938_v39, %v928_v37 }
 0x267   : > { %v978_v33 = vpop.permute.xlu1 %977 }
 0x268   : > { %v981_v28 = vmul.f32 %v978_v33, %v2393_v32  ;;  %v975_v51 = vadd.f32 %v973_v35, %v957_v34 }
 0x26a   : > { %v991_v1 = vmul.f32 %v985_v50, %v981_v28  ;;  %v958_v50 = vadd.f32 %v956_v8, %v940_v36 }
 0x26b   : > { %v996_v41 = vpop.permute.xlu1 %995 }
 0x26c   : > { %v999_v53 = vmul.f32 %v2406_v22, %v996_v41  ;;  %v993_v52 = vadd.f32 %v991_v1, %v975_v51  ;;  %v976_v29 = vadd.f32 %v974_v14, %v958_v50  ;;  %v1359_v22 = vld [vmem:[%s2180_s21] sm:$0xff] }
 0x26e   : > { %v1009_v55 = vmul.f32 %v1003_v9, %v999_v53 }
 0x26f   : > { %v980_v4 = vpop.permute.xlu1 %979 }
 0x270   : > { %v1011_v3 = vadd.f32 %v1009_v55, %v993_v52  ;;  %v982_v54 = vmul.f32 %v980_v4, %v2393_v32 }
 0x272   : > { %v1021_v6 = vadd.f32 %v2602_v21, %v1011_v3  ;;  %v992_v7 = vmul.f32 %v2600_v44, %v982_v54 }
 0x274   : > { %v1031_v57 = vmul.f32 %v2608_v47, %v1021_v6  ;;  %v994_v32 = vadd.f32 %v992_v7, %v976_v29 }
 0x276   : > { %1272 = vmatmul.mubr.f32.vlgmr.msra.gmra.mrb[0].mxu0 %v1031_v57  ;;  %1758 = vmatprep.mubr.f32.mxu1 %v1031_v57  ;;  %v1012_v9 = vadd.f32 %v1010_v42, %v994_v32 }
 0x277   : > { %1277 = vmatprep.mubr.f32.mxu0 %v2060_v16  ;;  %v1361_v16 = vld [vmem:[%s2180_s21 + $0x10] sm:$0xff] }
 0x278   : > { %v1022_v44 = vadd.f32 %v2606_v46, %v1012_v9 }
 0x280   : > { %v1029_v21 = vpop.permute.xlu1 %1028 }
 0x281   : > { %v1032_v47 = vmul.f32 %v1029_v21, %v1022_v44 }
 0x283   : > { %1278 = vmatmul.mubr.f32.gmra.mrb[2].mxu0 %v1032_v47  ;;  %1759 = vmatmul.mubr.f32.vlgmr.msra.gmra.mrb[0].mxu1 %v1032_v47 }
 0x349   : > { %v1273_v60 = vpop.f32.mrb[0].mxu0 }
 0x34a   : > { %v1365_v45 = vadd.f32 %v1359_v22, %v1273_v60  ;;  %v1275_v11 = vpop.f32.mrb[1].mxu0 }
 0x34b   : > { %v1366_v13 = vadd.f32 %v1360_v5, %v1275_v11 }
 0x34c   : > { %1371 = vst [vmem:[%s2195_s11] sm:$0xff] %v1365_v45 }
 0x34d   : > { %1372 = vst [vmem:[%s2195_s11 + $0x8] sm:$0xff] %v1366_v13 }
 0x356   : > { %v1279_v46 = vpop.f32.mrb[2].mxu0  ;;  %v1760_v61 = vpop.f32.mrb[0].mxu1 }
 0x357   : > { %v1368_v12 = vadd.f32 %v1362_v59, %v1279_v46  ;;  %v1370_v15 = vadd.f32 %v1760_v61, %v1364_v19  ;;  %v1281_v58 = vpop.f32.mrb[3].mxu0  ;;  %v1350_v18 = vpop.f32.mrb[1].mxu1 }
 0x358   : > { %v1369_v17 = vadd.f32 %v1363_v20, %v1281_v58  ;;  %v1367_v24 = vadd.f32 %v1361_v16, %v1350_v18 }
 0x359   : > { %1374 = vst [vmem:[%s2195_s11 + $0x18] sm:$0xff] %v1368_v12  ;;  %1376 = vst [vmem:[%s2195_s11 + $0x28] sm:$0xff] %v1370_v15 }
 0x35a   : > { %1373 = vst [vmem:[%s2195_s11 + $0x10] sm:$0xff] %v1367_v24  ;;  %1375 = vst [vmem:[%s2195_s11 + $0x20] sm:$0xff] %v1369_v17 }
 0x35b PF: > { %s17_s30 = sadd.s32 1, %s2023_s30   ;;  %s2687_s27 = sld [smem:[#allocation4_spill]] }
 0x35c   : > { %p14_p0 = scmp.ge.s32.totalorder %s17_s30, 8   ;;  %s2688_s0 = sld [smem:[#allocation5_spill]] }
 0x35d   : > { %s2689_s29 = sld [smem:[#allocation6_spill]]  ;;  %s2690_s24 = smov %s2003_s25 }
 0x35e   : > { %s2691_s25 = smov %s2152_s14  ;;  %s2692_s26 = smov %s2015_s28 }
 0x35f   :  { %16 = sbr.rel (!%p14_p0) target bundleno = 6 (0x6), region = 147 }
 0x362   : > { %s2693_s28 = smov %s2688_s0 }

</bundles_post_ra>
